<compile_context>
chip_gen: v7x
topology: tpu7x:2x2x1
jax: 0.10.0
libtpu: 0.0.40
codegen_flags: <defaults>
</compile_context>

<pallas_src>
import functools
import math

import jax
import jax.numpy as jnp
from jax.experimental import pallas as pl
from jax.experimental.pallas import tpu as pltpu


_LN_EPS = 1e-5
_LVEC_ROWS = 8
# rows of the per-layer packed vector slab
_R_IPB, _R_OPB, _R_LN1G, _R_LN1B, _R_FFB2, _R_LN2G, _R_LN2B = range(7)


def _layernorm(z, g, b):
    mean = jnp.mean(z, axis=-1, keepdims=True)
    var = jnp.mean((z - mean) * (z - mean), axis=-1, keepdims=True)
    return (z - mean) * jax.lax.rsqrt(var + _LN_EPS) * g + b


# ------------------------- fused forward kernel --------------------------------

def _tf_forward_kernel(x_ref, pe_ref, mask_ref, small_ref, lvec_ref,
                       ipw_ref, opw_ref, ffw1_ref, ffb1_ref, ffw2_ref,
                       o_ref, h_ref, *, S, D, H, n_attr, hw, ow, si):
    """One (batch element, encoder layer) grid step of the full forward pass."""
    hd = D // H
    Dh = D // 2
    scale = 1.0 / math.sqrt(hd)
    l = pl.program_id(1)

    def small(name, r, c):
        return small_ref[si[name]][0:r, 0:c]

    # ---- l == 0: input MLP encoder + (batch-indexed) positional encoding ----
    @pl.when(l == 0)
    def _():
        x = x_ref[...]                                             # (S, n_attr)
        h0 = jnp.dot(x, small("enc_w1", n_attr, Dh),
                     preferred_element_type=jnp.float32) + small("enc_b1", 1, Dh)
        h0 = jnp.maximum(h0, 0.0)
        h0 = jnp.dot(h0, small("enc_w2", Dh, D),
                     preferred_element_type=jnp.float32) + small("enc_b2", 1, D)
        # NOTE: the reference indexes pe by the *batch* index (pe[:x.size(0)] on
        # a batch-first tensor) and broadcasts over the sequence; pe_ref holds
        # exactly that per-batch row.
        # TODO(synk): dropout layers (p=0.5) are eval-mode identities here.
        h_ref[...] = h0 + pe_ref[...]

    # ---- transformer encoder layer `l` (post-norm, ReLU FFN) ----
    h = h_ref[...]                                                 # (S, D) f32
    lv = lvec_ref[...]                                             # (8, C) packed rows

    qkv = jnp.dot(h, ipw_ref[...], preferred_element_type=jnp.float32)
    qkv = qkv + lv[_R_IPB:_R_IPB + 1, :3 * D]                      # (S, 3D)

    # all heads batched into the leading (batch) dim of single dot_generals
    qg = jnp.stack([qkv[:, hh * hd:(hh + 1) * hd] for hh in range(H)], axis=0)
    kg = jnp.stack([qkv[:, D + hh * hd:D + (hh + 1) * hd] for hh in range(H)], axis=0)
    vg = jnp.stack([qkv[:, 2 * D + hh * hd:2 * D + (hh + 1) * hd] for hh in range(H)],
                   axis=0)

    s = jax.lax.dot_general(qg, kg, (((2,), (2,)), ((0,), (0,))),
                            preferred_element_type=jnp.float32)     # (H, S, S)
    s = s * scale + mask_ref[...][None, :, :]
    m = jnp.max(s, axis=-1, keepdims=True)
    p = jnp.exp(s - m)
    p = p * pl.reciprocal(jnp.sum(p, axis=-1, keepdims=True), approx=True)
    og = jax.lax.dot_general(p, vg, (((2,), (1,)), ((0,), (0,))),
                             preferred_element_type=jnp.float32)    # (H, S, hd)

    ctx = jnp.concatenate([og[hh] for hh in range(H)], axis=-1)      # (S, D)
    attn = jnp.dot(ctx, opw_ref[...], preferred_element_type=jnp.float32)
    attn = attn + lv[_R_OPB:_R_OPB + 1, :D]

    h1 = _layernorm(h + attn, lv[_R_LN1G:_R_LN1G + 1, :D],
                    lv[_R_LN1B:_R_LN1B + 1, :D])

    # FFN: bf16 weights (the only HBM-heavy tensors), f32 accumulation.
    # TODO(synk): on v6e/v7x the (S, dff) intermediate could stay bf16 between the
    # two FFN matmuls (bf16 VPU); kept f32 so the same kernel is correct on v5e.
    w1 = ffw1_ref[...]
    f = jnp.dot(h1.astype(w1.dtype), w1,
                preferred_element_type=jnp.float32) + ffb1_ref[...]
    f = jnp.maximum(f, 0.0)
    w2 = ffw2_ref[...]
    f = jnp.dot(f.astype(w2.dtype), w2,
                preferred_element_type=jnp.float32) + lv[_R_FFB2:_R_FFB2 + 1, :D]

    h2 = _layernorm(h1 + f, lv[_R_LN2G:_R_LN2G + 1, :D],
                    lv[_R_LN2B:_R_LN2B + 1, :D])
    h_ref[...] = h2

    # ---- last layer: prediction head (column 0 only) + linear2 ----
    @pl.when(l == pl.num_programs(1) - 1)
    def _():
        t = jnp.dot(h2, small("head_w1", D, Dh),
                    preferred_element_type=jnp.float32) + small("head_b1", 1, Dh)
        t = jnp.maximum(t, 0.0)
        ycol = jnp.dot(t, small("head_w2c0", Dh, 1),
                       preferred_element_type=jnp.float32) + small("head_b2c0", 1, 1)
        # (S, 1) -> (1, iw) relayout (iw == S) via a masked sublane reduction
        # (no reshape / transpose of sublanes into lanes).
        ii = jax.lax.broadcasted_iota(jnp.int32, (S, S), 0)
        jj = jax.lax.broadcasted_iota(jnp.int32, (S, S), 1)
        eye = (ii == jj).astype(jnp.float32)
        yrow = jnp.sum(ycol * eye, axis=0, keepdims=True)            # (1, S)

        z = jnp.dot(yrow, small("lin2_w1", S, hw),
                    preferred_element_type=jnp.float32) + small("lin2_b1", 1, hw)
        z = jnp.maximum(z, 0.0)
        z = jnp.dot(z, small("lin2_w2", hw, ow),
                    preferred_element_type=jnp.float32) + small("lin2_b2", 1, ow)
        o_ref[...] = z.astype(o_ref.dtype)


# ------------------------------- model glue -----------------------------------

def positional_encoding(length, d_model):
    """Replicates PositionalEncoding.pe[:length, 0, :] -> (length, d_model)."""
    pos = jnp.arange(length, dtype=jnp.float32)[:, None]
    div = jnp.exp(jnp.arange(0, d_model, 2, dtype=jnp.float32)
                  * (-math.log(10000.0) / d_model))
    pe = jnp.zeros((length, d_model), jnp.float32)
    pe = pe.at[:, 0::2].set(jnp.sin(pos * div))
    pe = pe.at[:, 1::2].set(jnp.cos(pos * div))
    return pe


def generate_square_subsequent_mask(sz):
    i = jnp.arange(sz)[:, None]
    j = jnp.arange(sz)[None, :]
    return jnp.where(j <= i, 0.0, -jnp.inf).astype(jnp.float32)


def init_params(key, iw, ow, d_model, nhead, nlayers, n_attr, dff=2048):
    D = d_model
    keys = iter(jax.random.split(key, 8 + 8 * nlayers))

    def w(shape, scale=0.05):
        return jax.random.normal(next(keys), shape, jnp.float32) * scale

    def b(n):
        return jnp.zeros((1, n), jnp.float32)

    params = dict(
        enc_w1=w((n_attr, D // 2)), enc_b1=b(D // 2),
        enc_w2=w((D // 2, D)), enc_b2=b(D),
        head_w1=w((D, D // 2)), head_b1=b(D // 2),
        head_w2=w((D // 2, n_attr)), head_b2=b(n_attr),
        lin2_w1=w((iw, (iw + ow) // 2)), lin2_b1=b((iw + ow) // 2),
        lin2_w2=w(((iw + ow) // 2, ow)), lin2_b2=b(ow),
        layers=[],
    )
    for _ in range(nlayers):
        params["layers"].append(dict(
            in_proj_w=w((D, 3 * D)), in_proj_b=b(3 * D),
            out_proj_w=w((D, D)), out_proj_b=b(D),
            # bf16 storage for the bandwidth-relevant FFN weights (f32 accum)
            ff_w1=w((D, dff)).astype(jnp.bfloat16), ff_b1=b(dff),
            ff_w2=w((dff, D)).astype(jnp.bfloat16), ff_b2=b(D),
            ln1_g=jnp.ones((1, D), jnp.float32), ln1_b=jnp.zeros((1, D), jnp.float32),
            ln2_g=jnp.ones((1, D), jnp.float32), ln2_b=jnp.zeros((1, D), jnp.float32),
        ))
    return params


def tf_model_forward(params, src, srcmask, *, d_model, nhead, nlayers):
    B, S, n_attr = src.shape
    D, H = d_model, nhead
    Dh = D // 2
    hw = params["lin2_w1"].shape[1]
    ow = params["lin2_w2"].shape[1]
    dff = params["layers"][0]["ff_w1"].shape[1]

    x = src.astype(jnp.float32)                                      # (B, S, n_attr)
    srcmask = srcmask.astype(jnp.float32)                            # (S, S)
    # batch-indexed positional-encoding rows (reference quirk preserved)
    pe_rows = positional_encoding(B, D)[:, None, :]                  # (B, 1, D)

    # ---- pack the small weights / biases into a single (n, maxr, maxc) slab ----
    small_items = [
        ("enc_w1", params["enc_w1"]), ("enc_b1", params["enc_b1"]),
        ("enc_w2", params["enc_w2"]), ("enc_b2", params["enc_b2"]),
        ("head_w1", params["head_w1"]), ("head_b1", params["head_b1"]),
        ("head_w2c0", params["head_w2"][:, :1]),
        ("head_b2c0", params["head_b2"][:, :1]),
        ("lin2_w1", params["lin2_w1"]), ("lin2_b1", params["lin2_b1"]),
        ("lin2_w2", params["lin2_w2"]), ("lin2_b2", params["lin2_b2"]),
    ]
    maxr = max(a.shape[0] for _, a in small_items)
    maxc = max(a.shape[1] for _, a in small_items)
    small_slab = jnp.stack([
        jnp.pad(a.astype(jnp.float32),
                ((0, maxr - a.shape[0]), (0, maxc - a.shape[1])))
        for _, a in small_items])
    si = {name: idx for idx, (name, _) in enumerate(small_items)}

    # ---- stack per-layer params along a leading nlayers (grid) axis ----
    C = ((3 * D + 127) // 128) * 128

    def _row(v):
        v = v.reshape(1, -1).astype(jnp.float32)
        return jnp.pad(v, ((0, 0), (0, C - v.shape[1])))

    lvec, ipw, opw, ffw1, ffb1, ffw2 = [], [], [], [], [], []
    for lp in params["layers"]:
        rows = [_row(lp["in_proj_b"]), _row(lp["out_proj_b"]),
                _row(lp["ln1_g"]), _row(lp["ln1_b"]), _row(lp["ff_b2"]),
                _row(lp["ln2_g"]), _row(lp["ln2_b"])]
        rows += [jnp.zeros((1, C), jnp.float32)] * (_LVEC_ROWS - len(rows))
        lvec.append(jnp.concatenate(rows, axis=0))
        ipw.append(lp["in_proj_w"]); opw.append(lp["out_proj_w"])
        ffw1.append(lp["ff_w1"]); ffb1.append(lp["ff_b1"]); ffw2.append(lp["ff_w2"])
    lvec = jnp.stack(lvec)        # (nlayers, 8, C)   f32
    ipw = jnp.stack(ipw)          # (nlayers, D, 3D)  f32
    opw = jnp.stack(opw)          # (nlayers, D, D)   f32
    ffw1 = jnp.stack(ffw1)        # (nlayers, D, dff) bf16
    ffb1 = jnp.stack(ffb1)        # (nlayers, 1, dff) f32
    ffw2 = jnp.stack(ffw2)        # (nlayers, dff, D) bf16

    inputs = (x, pe_rows, srcmask, small_slab, lvec, ipw, opw, ffw1, ffb1, ffw2)

    # advisory cost estimate (helps XLA schedule around the custom call)
    hd = D // H
    BS = B * S
    flops_layer = (2 * BS * D * 3 * D + 4 * B * H * S * S * hd
                   + 2 * BS * D * D + 4 * BS * D * dff)
    flops = (nlayers * flops_layer
             + 2 * BS * (n_attr * Dh + Dh * D)
             + 2 * BS * (D * Dh + Dh)
             + 2 * B * (S * hw + hw * ow))
    transcendentals = nlayers * B * H * S * S + 4 * nlayers * BS
    bytes_accessed = int(sum(a.size * a.dtype.itemsize for a in inputs) + B * ow * 4)

    kernel = functools.partial(_tf_forward_kernel, S=S, D=D, H=H,
                               n_attr=n_attr, hw=hw, ow=ow, si=si)

    out = pl.pallas_call(
        kernel,
        out_shape=jax.ShapeDtypeStruct((B, 1, ow), jnp.float32),
        grid=(B, nlayers),
        in_specs=[
            pl.BlockSpec((None, S, n_attr), lambda b, l: (b, 0, 0)),      # src block
            pl.BlockSpec((None, 1, D), lambda b, l: (b, 0, 0)),           # pe row
            pl.BlockSpec((S, S), lambda b, l: (0, 0)),                    # srcmask
            pl.BlockSpec(small_slab.shape, lambda b, l: (0, 0, 0)),       # packed small
            pl.BlockSpec((None, _LVEC_ROWS, C), lambda b, l: (l, 0, 0)),  # layer vec rows
            pl.BlockSpec((None, D, 3 * D), lambda b, l: (l, 0, 0)),       # in_proj_w
            pl.BlockSpec((None, D, D), lambda b, l: (l, 0, 0)),           # out_proj_w
            pl.BlockSpec((None, D, dff), lambda b, l: (l, 0, 0)),         # ff_w1 (bf16)
            pl.BlockSpec((None, 1, dff), lambda b, l: (l, 0, 0)),         # ff_b1
            pl.BlockSpec((None, dff, D), lambda b, l: (l, 0, 0)),         # ff_w2 (bf16)
        ],
        out_specs=pl.BlockSpec((None, 1, ow), lambda b, l: (b, 0, 0)),
        scratch_shapes=[pltpu.VMEM((S, D), jnp.float32)],                 # carried h
        compiler_params=pltpu.CompilerParams(
            dimension_semantics=("parallel", "arbitrary")),
        cost_estimate=pl.CostEstimate(flops=int(flops),
                                      transcendentals=int(transcendentals),
                                      bytes_accessed=bytes_accessed),
    )(*inputs)
    return out.reshape(B, ow)


# ---------------------------------- main ---------------------------------------

if __name__ == "__main__":
    iw, ow = 8, 4
    d_model, nhead, nlayers, n_attr = 32, 4, 2, 1
    B = 2

    key = jax.random.PRNGKey(0)
    kp, kx = jax.random.split(key)
    params = init_params(kp, iw, ow, d_model, nhead, nlayers, n_attr)

    src = jax.random.normal(kx, (B, iw, n_attr), jnp.float32)
    srcmask = generate_square_subsequent_mask(iw)

    fwd = jax.jit(functools.partial(tf_model_forward, d_model=d_model,
                                    nhead=nhead, nlayers=nlayers))
    out = fwd(params, src, srcmask)
    out = jax.block_until_ready(out)

    assert out.shape == (B, ow), out.shape
    assert bool(jnp.all(jnp.isfinite(out)))
    print("KERNEL_OK")
</pallas_src>

<mosaic_0001>
module attributes {stable_mosaic.version = 11 : i64} {
  func.func @_tf_forward_kernel(%arg0: i32, %arg1: i32, %arg2: memref<1x8x1xf32, #tpu.memory_space<vmem>>, %arg3: memref<1x1x32xf32, #tpu.memory_space<vmem>>, %arg4: memref<8x8xf32, #tpu.memory_space<vmem>>, %arg5: memref<12x32x32xf32, #tpu.memory_space<vmem>>, %arg6: memref<1x8x128xf32, #tpu.memory_space<vmem>>, %arg7: memref<1x32x96xf32, #tpu.memory_space<vmem>>, %arg8: memref<1x32x32xf32, #tpu.memory_space<vmem>>, %arg9: memref<1x32x2048xbf16, #tpu.memory_space<vmem>>, %arg10: memref<1x1x2048xf32, #tpu.memory_space<vmem>>, %arg11: memref<1x2048x32xbf16, #tpu.memory_space<vmem>>, %arg12: memref<1x1x4xf32, #tpu.memory_space<vmem>>, %arg13: memref<8x32xf32, #tpu.memory_space<vmem>>) attributes {dimension_semantics = [#tpu.dimension_semantics<parallel>, #tpu.dimension_semantics<arbitrary>], iteration_bounds = array<i64: 2, 2>, scalar_prefetch = 0 : i64, scratch_operands = 1 : i64, tpu.core_type = #tpu.core_type<tc>, window_params = [{transform_indices = @transform_0, window_bounds = array<i64: 1, 8, 1>}, {transform_indices = @transform_1, window_bounds = array<i64: 1, 1, 32>}, {pipeline_mode = #tpu.pipeline_mode<synchronous>, transform_indices = @transform_2, window_bounds = array<i64: 8, 8>}, {pipeline_mode = #tpu.pipeline_mode<synchronous>, transform_indices = @transform_3, window_bounds = array<i64: 12, 32, 32>}, {transform_indices = @transform_4, window_bounds = array<i64: 1, 8, 128>}, {transform_indices = @transform_5, window_bounds = array<i64: 1, 32, 96>}, {transform_indices = @transform_6, window_bounds = array<i64: 1, 32, 32>}, {transform_indices = @transform_7, window_bounds = array<i64: 1, 32, 2048>}, {transform_indices = @transform_8, window_bounds = array<i64: 1, 1, 2048>}, {transform_indices = @transform_9, window_bounds = array<i64: 1, 2048, 32>}, {transform_indices = @transform_10, window_bounds = array<i64: 1, 1, 4>}]} {
    %c0_i32 = arith.constant 0 : i32
    %0 = arith.cmpi eq, %arg1, %c0_i32 : i32
    %1 = arith.extui %0 : i1 to i32
    %c0_i32_0 = arith.constant 0 : i32
    %2 = arith.cmpi ne, %1, %c0_i32_0 : i32
    scf.if %2 {
      %c0_44 = arith.constant 0 : index
      %c0_45 = arith.constant 0 : index
      %c0_46 = arith.constant 0 : index
      %147 = vector.load %arg2[%c0_44, %c0_45, %c0_46] : memref<1x8x1xf32, #tpu.memory_space<vmem>>, vector<1x8x1xf32>
      %148 = vector.shape_cast %147 : vector<1x8x1xf32> to vector<8x1xf32>
      %c0_47 = arith.constant 0 : index
      %c0_48 = arith.constant 0 : index
      %c0_49 = arith.constant 0 : index
      %149 = vector.load %arg5[%c0_47, %c0_48, %c0_49] : memref<12x32x32xf32, #tpu.memory_space<vmem>>, vector<1x32x32xf32>
      %150 = vector.shape_cast %149 : vector<1x32x32xf32> to vector<32x32xf32>
      %151 = vector.extract_strided_slice %150 {offsets = [0, 0], sizes = [1, 16], strides = [1, 1]} : vector<32x32xf32> to vector<1x16xf32>
      %cst_50 = arith.constant dense<0.000000e+00> : vector<8x16xf32>
      %152 = tpu.matmul %148, %151, %cst_50 {dimension_numbers = #tpu.dot_dimension_numbers<[1], [0], [0], [1], [0, 0, 1, 1], [], []>} : vector<8x1xf32>, vector<1x16xf32>, vector<8x16xf32> -> vector<8x16xf32>
      %c1 = arith.constant 1 : index
      %c0_51 = arith.constant 0 : index
      %c0_52 = arith.constant 0 : index
      %153 = vector.load %arg5[%c1, %c0_51, %c0_52] : memref<12x32x32xf32, #tpu.memory_space<vmem>>, vector<1x32x32xf32>
      %154 = vector.shape_cast %153 : vector<1x32x32xf32> to vector<32x32xf32>
      %155 = vector.extract_strided_slice %154 {offsets = [0, 0], sizes = [1, 16], strides = [1, 1]} : vector<32x32xf32> to vector<1x16xf32>
      %156 = vector.broadcast %155 : vector<1x16xf32> to vector<8x16xf32>
      %157 = arith.addf %152, %156 : vector<8x16xf32>
      %cst_53 = arith.constant 0.000000e+00 : f32
      %158 = vector.broadcast %cst_53 : f32 to vector<8x16xf32>
      %159 = arith.maximumf %157, %158 : vector<8x16xf32>
      %c2 = arith.constant 2 : index
      %c0_54 = arith.constant 0 : index
      %c0_55 = arith.constant 0 : index
      %160 = vector.load %arg5[%c2, %c0_54, %c0_55] : memref<12x32x32xf32, #tpu.memory_space<vmem>>, vector<1x32x32xf32>
      %161 = vector.shape_cast %160 : vector<1x32x32xf32> to vector<32x32xf32>
      %162 = vector.extract_strided_slice %161 {offsets = [0, 0], sizes = [16, 32], strides = [1, 1]} : vector<32x32xf32> to vector<16x32xf32>
      %cst_56 = arith.constant dense<0.000000e+00> : vector<8x32xf32>
      %163 = tpu.matmul %159, %162, %cst_56 {dimension_numbers = #tpu.dot_dimension_numbers<[1], [0], [0], [1], [0, 0, 1, 1], [], []>} : vector<8x16xf32>, vector<16x32xf32>, vector<8x32xf32> -> vector<8x32xf32>
      %c3 = arith.constant 3 : index
      %c0_57 = arith.constant 0 : index
      %c0_58 = arith.constant 0 : index
      %164 = vector.load %arg5[%c3, %c0_57, %c0_58] : memref<12x32x32xf32, #tpu.memory_space<vmem>>, vector<1x32x32xf32>
      %165 = vector.shape_cast %164 : vector<1x32x32xf32> to vector<32x32xf32>
      %166 = vector.extract_strided_slice %165 {offsets = [0, 0], sizes = [1, 32], strides = [1, 1]} : vector<32x32xf32> to vector<1x32xf32>
      %167 = vector.broadcast %166 : vector<1x32xf32> to vector<8x32xf32>
      %168 = arith.addf %163, %167 : vector<8x32xf32>
      %c0_59 = arith.constant 0 : index
      %c0_60 = arith.constant 0 : index
      %c0_61 = arith.constant 0 : index
      %169 = vector.load %arg3[%c0_59, %c0_60, %c0_61] : memref<1x1x32xf32, #tpu.memory_space<vmem>>, vector<1x1x32xf32>
      %170 = vector.shape_cast %169 : vector<1x1x32xf32> to vector<1x32xf32>
      %171 = vector.broadcast %170 : vector<1x32xf32> to vector<8x32xf32>
      %172 = arith.addf %168, %171 : vector<8x32xf32>
      %c0_62 = arith.constant 0 : index
      %c0_63 = arith.constant 0 : index
      %173 = vector.load %arg13[%c0_62, %c0_63] : memref<8x32xf32, #tpu.memory_space<vmem>>, vector<8x32xf32>
      tpu.vector_store %arg13[%c0_62, %c0_63], %172 {strides = array<i32>} : memref<8x32xf32, #tpu.memory_space<vmem>>, vector<8x32xf32>,
    } else {
    }
    %c0 = arith.constant 0 : index
    %c0_1 = arith.constant 0 : index
    %3 = vector.load %arg13[%c0, %c0_1] : memref<8x32xf32, #tpu.memory_space<vmem>>, vector<8x32xf32>
    %c0_2 = arith.constant 0 : index
    %c0_3 = arith.constant 0 : index
    %c0_4 = arith.constant 0 : index
    %4 = vector.load %arg6[%c0_2, %c0_3, %c0_4] : memref<1x8x128xf32, #tpu.memory_space<vmem>>, vector<1x8x128xf32>
    %5 = vector.shape_cast %4 : vector<1x8x128xf32> to vector<8x128xf32>
    %c0_5 = arith.constant 0 : index
    %c0_6 = arith.constant 0 : index
    %c0_7 = arith.constant 0 : index
    %6 = vector.load %arg7[%c0_5, %c0_6, %c0_7] : memref<1x32x96xf32, #tpu.memory_space<vmem>>, vector<1x32x96xf32>
    %7 = vector.shape_cast %6 : vector<1x32x96xf32> to vector<32x96xf32>
    %cst = arith.constant dense<0.000000e+00> : vector<8x96xf32>
    %8 = tpu.matmul %3, %7, %cst {dimension_numbers = #tpu.dot_dimension_numbers<[1], [0], [0], [1], [0, 0, 1, 1], [], []>} : vector<8x32xf32>, vector<32x96xf32>, vector<8x96xf32> -> vector<8x96xf32>
    %9 = vector.extract_strided_slice %5 {offsets = [0, 0], sizes = [1, 96], strides = [1, 1]} : vector<8x128xf32> to vector<1x96xf32>
    %10 = vector.broadcast %9 : vector<1x96xf32> to vector<8x96xf32>
    %11 = arith.addf %8, %10 : vector<8x96xf32>
    %12 = vector.extract_strided_slice %11 {offsets = [0, 0], sizes = [8, 8], strides = [1, 1]} : vector<8x96xf32> to vector<8x8xf32>
    %13 = vector.extract_strided_slice %11 {offsets = [0, 8], sizes = [8, 8], strides = [1, 1]} : vector<8x96xf32> to vector<8x8xf32>
    %14 = vector.extract_strided_slice %11 {offsets = [0, 16], sizes = [8, 8], strides = [1, 1]} : vector<8x96xf32> to vector<8x8xf32>
    %15 = vector.extract_strided_slice %11 {offsets = [0, 24], sizes = [8, 8], strides = [1, 1]} : vector<8x96xf32> to vector<8x8xf32>
    %16 = vector.shape_cast %12 : vector<8x8xf32> to vector<1x8x8xf32>
    %17 = vector.shape_cast %13 : vector<8x8xf32> to vector<1x8x8xf32>
    %18 = vector.shape_cast %14 : vector<8x8xf32> to vector<1x8x8xf32>
    %19 = vector.shape_cast %15 : vector<8x8xf32> to vector<1x8x8xf32>
    %20 = tpu.concatenate %16, %17, %18, %19 in 0 : vector<1x8x8xf32>, vector<1x8x8xf32>, vector<1x8x8xf32>, vector<1x8x8xf32> -> vector<4x8x8xf32>
    %21 = vector.extract_strided_slice %11 {offsets = [0, 32], sizes = [8, 8], strides = [1, 1]} : vector<8x96xf32> to vector<8x8xf32>
    %22 = vector.extract_strided_slice %11 {offsets = [0, 40], sizes = [8, 8], strides = [1, 1]} : vector<8x96xf32> to vector<8x8xf32>
    %23 = vector.extract_strided_slice %11 {offsets = [0, 48], sizes = [8, 8], strides = [1, 1]} : vector<8x96xf32> to vector<8x8xf32>
    %24 = vector.extract_strided_slice %11 {offsets = [0, 56], sizes = [8, 8], strides = [1, 1]} : vector<8x96xf32> to vector<8x8xf32>
    %25 = vector.shape_cast %21 : vector<8x8xf32> to vector<1x8x8xf32>
    %26 = vector.shape_cast %22 : vector<8x8xf32> to vector<1x8x8xf32>
    %27 = vector.shape_cast %23 : vector<8x8xf32> to vector<1x8x8xf32>
    %28 = vector.shape_cast %24 : vector<8x8xf32> to vector<1x8x8xf32>
    %29 = tpu.concatenate %25, %26, %27, %28 in 0 : vector<1x8x8xf32>, vector<1x8x8xf32>, vector<1x8x8xf32>, vector<1x8x8xf32> -> vector<4x8x8xf32>
    %30 = vector.extract_strided_slice %11 {offsets = [0, 64], sizes = [8, 8], strides = [1, 1]} : vector<8x96xf32> to vector<8x8xf32>
    %31 = vector.extract_strided_slice %11 {offsets = [0, 72], sizes = [8, 8], strides = [1, 1]} : vector<8x96xf32> to vector<8x8xf32>
    %32 = vector.extract_strided_slice %11 {offsets = [0, 80], sizes = [8, 8], strides = [1, 1]} : vector<8x96xf32> to vector<8x8xf32>
    %33 = vector.extract_strided_slice %11 {offsets = [0, 88], sizes = [8, 8], strides = [1, 1]} : vector<8x96xf32> to vector<8x8xf32>
    %34 = vector.shape_cast %30 : vector<8x8xf32> to vector<1x8x8xf32>
    %35 = vector.shape_cast %31 : vector<8x8xf32> to vector<1x8x8xf32>
    %36 = vector.shape_cast %32 : vector<8x8xf32> to vector<1x8x8xf32>
    %37 = vector.shape_cast %33 : vector<8x8xf32> to vector<1x8x8xf32>
    %38 = tpu.concatenate %34, %35, %36, %37 in 0 : vector<1x8x8xf32>, vector<1x8x8xf32>, vector<1x8x8xf32>, vector<1x8x8xf32> -> vector<4x8x8xf32>
    %cst_8 = arith.constant dense<0.000000e+00> : vector<4x8x8xf32>
    %39 = tpu.matmul %20, %29, %cst_8 {dimension_numbers = #tpu.dot_dimension_numbers<[2], [2], [1], [1], [0, 0, 0, 1, 1, 1], [0], [0]>} : vector<4x8x8xf32>, vector<4x8x8xf32>, vector<4x8x8xf32> -> vector<4x8x8xf32>
    %cst_9 = arith.constant 0.353553385 : f32
    %40 = vector.broadcast %cst_9 : f32 to vector<4x8x8xf32>
    %41 = arith.mulf %39, %40 : vector<4x8x8xf32>
    %c0_10 = arith.constant 0 : index
    %c0_11 = arith.constant 0 : index
    %42 = vector.load %arg4[%c0_10, %c0_11] : memref<8x8xf32, #tpu.memory_space<vmem>>, vector<8x8xf32>
    %43 = vector.shape_cast %42 : vector<8x8xf32> to vector<1x8x8xf32>
    %44 = vector.broadcast %43 : vector<1x8x8xf32> to vector<4x8x8xf32>
    %45 = arith.addf %41, %44 : vector<4x8x8xf32>
    %cst_12 = arith.constant dense<0xFF800000> : vector<4x8xf32>
    %46 = vector.multi_reduction <maximumf>, %45, %cst_12 [2] : vector<4x8x8xf32> to vector<4x8xf32>
    %47 = vector.shape_cast %46 : vector<4x8xf32> to vector<4x8x1xf32>
    %48 = vector.broadcast %47 : vector<4x8x1xf32> to vector<4x8x8xf32>
    %49 = arith.subf %45, %48 : vector<4x8x8xf32>
    %50 = math.exp %49 : vector<4x8x8xf32>
    %cst_13 = arith.constant dense<0.000000e+00> : vector<4x8xf32>
    %51 = vector.multi_reduction <add>, %50, %cst_13 [2] : vector<4x8x8xf32> to vector<4x8xf32>
    %52 = vector.shape_cast %51 : vector<4x8xf32> to vector<4x8x1xf32>
    %53 = tpu.reciprocal %52 {approx = true} : vector<4x8x1xf32> -> vector<4x8x1xf32>
    %54 = vector.broadcast %53 : vector<4x8x1xf32> to vector<4x8x8xf32>
    %55 = arith.mulf %50, %54 : vector<4x8x8xf32>
    %cst_14 = arith.constant dense<0.000000e+00> : vector<4x8x8xf32>
    %56 = tpu.matmul %55, %38, %cst_14 {dimension_numbers = #tpu.dot_dimension_numbers<[2], [1], [1], [2], [0, 0, 0, 1, 1, 2], [0], [0]>} : vector<4x8x8xf32>, vector<4x8x8xf32>, vector<4x8x8xf32> -> vector<4x8x8xf32>
    %57 = vector.extract_strided_slice %56 {offsets = [0, 0, 0], sizes = [1, 8, 8], strides = [1, 1, 1]} : vector<4x8x8xf32> to vector<1x8x8xf32>
    %58 = vector.shape_cast %57 : vector<1x8x8xf32> to vector<8x8xf32>
    %59 = vector.extract_strided_slice %56 {offsets = [1, 0, 0], sizes = [1, 8, 8], strides = [1, 1, 1]} : vector<4x8x8xf32> to vector<1x8x8xf32>
    %60 = vector.shape_cast %59 : vector<1x8x8xf32> to vector<8x8xf32>
    %61 = vector.extract_strided_slice %56 {offsets = [2, 0, 0], sizes = [1, 8, 8], strides = [1, 1, 1]} : vector<4x8x8xf32> to vector<1x8x8xf32>
    %62 = vector.shape_cast %61 : vector<1x8x8xf32> to vector<8x8xf32>
    %63 = vector.extract_strided_slice %56 {offsets = [3, 0, 0], sizes = [1, 8, 8], strides = [1, 1, 1]} : vector<4x8x8xf32> to vector<1x8x8xf32>
    %64 = vector.shape_cast %63 : vector<1x8x8xf32> to vector<8x8xf32>
    %65 = tpu.concatenate %58, %60, %62, %64 in 1 : vector<8x8xf32>, vector<8x8xf32>, vector<8x8xf32>, vector<8x8xf32> -> vector<8x32xf32>
    %c0_15 = arith.constant 0 : index
    %c0_16 = arith.constant 0 : index
    %c0_17 = arith.constant 0 : index
    %66 = vector.load %arg8[%c0_15, %c0_16, %c0_17] : memref<1x32x32xf32, #tpu.memory_space<vmem>>, vector<1x32x32xf32>
    %67 = vector.shape_cast %66 : vector<1x32x32xf32> to vector<32x32xf32>
    %cst_18 = arith.constant dense<0.000000e+00> : vector<8x32xf32>
    %68 = tpu.matmul %65, %67, %cst_18 {dimension_numbers = #tpu.dot_dimension_numbers<[1], [0], [0], [1], [0, 0, 1, 1], [], []>} : vector<8x32xf32>, vector<32x32xf32>, vector<8x32xf32> -> vector<8x32xf32>
    %69 = vector.extract_strided_slice %5 {offsets = [1, 0], sizes = [1, 32], strides = [1, 1]} : vector<8x128xf32> to vector<1x32xf32>
    %70 = vector.broadcast %69 : vector<1x32xf32> to vector<8x32xf32>
    %71 = arith.addf %68, %70 : vector<8x32xf32>
    %72 = arith.addf %3, %71 : vector<8x32xf32>
    %73 = vector.extract_strided_slice %5 {offsets = [2, 0], sizes = [1, 32], strides = [1, 1]} : vector<8x128xf32> to vector<1x32xf32>
    %74 = vector.extract_strided_slice %5 {offsets = [3, 0], sizes = [1, 32], strides = [1, 1]} : vector<8x128xf32> to vector<1x32xf32>
    %cst_19 = arith.constant dense<0.000000e+00> : vector<8xf32>
    %75 = vector.multi_reduction <add>, %72, %cst_19 [1] : vector<8x32xf32> to vector<8xf32>
    %76 = vector.shape_cast %75 : vector<8xf32> to vector<8x1xf32>
    %cst_20 = arith.constant 3.200000e+01 : f32
    %77 = vector.broadcast %cst_20 : f32 to vector<8x1xf32>
    %78 = arith.divf %76, %77 : vector<8x1xf32>
    %79 = vector.broadcast %78 : vector<8x1xf32> to vector<8x32xf32>
    %80 = arith.subf %72, %79 : vector<8x32xf32>
    %81 = vector.broadcast %78 : vector<8x1xf32> to vector<8x32xf32>
    %82 = arith.subf %72, %81 : vector<8x32xf32>
    %83 = arith.mulf %80, %82 : vector<8x32xf32>
    %cst_21 = arith.constant dense<0.000000e+00> : vector<8xf32>
    %84 = vector.multi_reduction <add>, %83, %cst_21 [1] : vector<8x32xf32> to vector<8xf32>
    %85 = vector.shape_cast %84 : vector<8xf32> to vector<8x1xf32>
    %cst_22 = arith.constant 3.200000e+01 : f32
    %86 = vector.broadcast %cst_22 : f32 to vector<8x1xf32>
    %87 = arith.divf %85, %86 : vector<8x1xf32>
    %88 = vector.broadcast %78 : vector<8x1xf32> to vector<8x32xf32>
    %89 = arith.subf %72, %88 : vector<8x32xf32>
    %cst_23 = arith.constant 9.99999974E-6 : f32
    %90 = vector.broadcast %cst_23 : f32 to vector<8x1xf32>
    %91 = arith.addf %87, %90 : vector<8x1xf32>
    %92 = math.rsqrt %91 : vector<8x1xf32>
    %93 = vector.broadcast %92 : vector<8x1xf32> to vector<8x32xf32>
    %94 = arith.mulf %89, %93 : vector<8x32xf32>
    %95 = vector.broadcast %73 : vector<1x32xf32> to vector<8x32xf32>
    %96 = arith.mulf %94, %95 : vector<8x32xf32>
    %97 = vector.broadcast %74 : vector<1x32xf32> to vector<8x32xf32>
    %98 = arith.addf %96, %97 : vector<8x32xf32>
    %c0_24 = arith.constant 0 : index
    %c0_25 = arith.constant 0 : index
    %c0_26 = arith.constant 0 : index
    %99 = vector.load %arg9[%c0_24, %c0_25, %c0_26] : memref<1x32x2048xbf16, #tpu.memory_space<vmem>>, vector<1x32x2048xbf16>
    %100 = vector.shape_cast %99 : vector<1x32x2048xbf16> to vector<32x2048xbf16>
    %101 = arith.truncf %98 : vector<8x32xf32> to vector<8x32xbf16>
    %cst_27 = arith.constant dense<0.000000e+00> : vector<8x2048xf32>
    %102 = tpu.matmul %101, %100, %cst_27 {dimension_numbers = #tpu.dot_dimension_numbers<[1], [0], [0], [1], [0, 0, 1, 1], [], []>} : vector<8x32xbf16>, vector<32x2048xbf16>, vector<8x2048xf32> -> vector<8x2048xf32>
    %c0_28 = arith.constant 0 : index
    %c0_29 = arith.constant 0 : index
    %c0_30 = arith.constant 0 : index
    %103 = vector.load %arg10[%c0_28, %c0_29, %c0_30] : memref<1x1x2048xf32, #tpu.memory_space<vmem>>, vector<1x1x2048xf32>
    %104 = vector.shape_cast %103 : vector<1x1x2048xf32> to vector<1x2048xf32>
    %105 = vector.broadcast %104 : vector<1x2048xf32> to vector<8x2048xf32>
    %106 = arith.addf %102, %105 : vector<8x2048xf32>
    %cst_31 = arith.constant 0.000000e+00 : f32
    %107 = vector.broadcast %cst_31 : f32 to vector<8x2048xf32>
    %108 = arith.maximumf %106, %107 : vector<8x2048xf32>
    %c0_32 = arith.constant 0 : index
    %c0_33 = arith.constant 0 : index
    %c0_34 = arith.constant 0 : index
    %109 = vector.load %arg11[%c0_32, %c0_33, %c0_34] : memref<1x2048x32xbf16, #tpu.memory_space<vmem>>, vector<1x2048x32xbf16>
    %110 = vector.shape_cast %109 : vector<1x2048x32xbf16> to vector<2048x32xbf16>
    %111 = arith.truncf %108 : vector<8x2048xf32> to vector<8x2048xbf16>
    %cst_35 = arith.constant dense<0.000000e+00> : vector<8x32xf32>
    %112 = tpu.matmul %111, %110, %cst_35 {dimension_numbers = #tpu.dot_dimension_numbers<[1], [0], [0], [1], [0, 0, 1, 1], [], []>} : vector<8x2048xbf16>, vector<2048x32xbf16>, vector<8x32xf32> -> vector<8x32xf32>
    %113 = vector.extract_strided_slice %5 {offsets = [4, 0], sizes = [1, 32], strides = [1, 1]} : vector<8x128xf32> to vector<1x32xf32>
    %114 = vector.broadcast %113 : vector<1x32xf32> to vector<8x32xf32>
    %115 = arith.addf %112, %114 : vector<8x32xf32>
    %116 = arith.addf %98, %115 : vector<8x32xf32>
    %117 = vector.extract_strided_slice %5 {offsets = [5, 0], sizes = [1, 32], strides = [1, 1]} : vector<8x128xf32> to vector<1x32xf32>
    %118 = vector.extract_strided_slice %5 {offsets = [6, 0], sizes = [1, 32], strides = [1, 1]} : vector<8x128xf32> to vector<1x32xf32>
    %cst_36 = arith.constant dense<0.000000e+00> : vector<8xf32>
    %119 = vector.multi_reduction <add>, %116, %cst_36 [1] : vector<8x32xf32> to vector<8xf32>
    %120 = vector.shape_cast %119 : vector<8xf32> to vector<8x1xf32>
    %cst_37 = arith.constant 3.200000e+01 : f32
    %121 = vector.broadcast %cst_37 : f32 to vector<8x1xf32>
    %122 = arith.divf %120, %121 : vector<8x1xf32>
    %123 = vector.broadcast %122 : vector<8x1xf32> to vector<8x32xf32>
    %124 = arith.subf %116, %123 : vector<8x32xf32>
    %125 = vector.broadcast %122 : vector<8x1xf32> to vector<8x32xf32>
    %126 = arith.subf %116, %125 : vector<8x32xf32>
    %127 = arith.mulf %124, %126 : vector<8x32xf32>
    %cst_38 = arith.constant dense<0.000000e+00> : vector<8xf32>
    %128 = vector.multi_reduction <add>, %127, %cst_38 [1] : vector<8x32xf32> to vector<8xf32>
    %129 = vector.shape_cast %128 : vector<8xf32> to vector<8x1xf32>
    %cst_39 = arith.constant 3.200000e+01 : f32
    %130 = vector.broadcast %cst_39 : f32 to vector<8x1xf32>
    %131 = arith.divf %129, %130 : vector<8x1xf32>
    %132 = vector.broadcast %122 : vector<8x1xf32> to vector<8x32xf32>
    %133 = arith.subf %116, %132 : vector<8x32xf32>
    %cst_40 = arith.constant 9.99999974E-6 : f32
    %134 = vector.broadcast %cst_40 : f32 to vector<8x1xf32>
    %135 = arith.addf %131, %134 : vector<8x1xf32>
    %136 = math.rsqrt %135 : vector<8x1xf32>
    %137 = vector.broadcast %136 : vector<8x1xf32> to vector<8x32xf32>
    %138 = arith.mulf %133, %137 : vector<8x32xf32>
    %139 = vector.broadcast %117 : vector<1x32xf32> to vector<8x32xf32>
    %140 = arith.mulf %138, %139 : vector<8x32xf32>
    %141 = vector.broadcast %118 : vector<1x32xf32> to vector<8x32xf32>
    %142 = arith.addf %140, %141 : vector<8x32xf32>
    %c0_41 = arith.constant 0 : index
    %c0_42 = arith.constant 0 : index
    %143 = vector.load %arg13[%c0_41, %c0_42] : memref<8x32xf32, #tpu.memory_space<vmem>>, vector<8x32xf32>
    tpu.vector_store %arg13[%c0_41, %c0_42], %142 {strides = array<i32>} : memref<8x32xf32, #tpu.memory_space<vmem>>, vector<8x32xf32>,
    %c1_i32 = arith.constant 1 : i32
    %144 = arith.cmpi eq, %arg1, %c1_i32 : i32
    %145 = arith.extui %144 : i1 to i32
    %c0_i32_43 = arith.constant 0 : i32
    %146 = arith.cmpi ne, %145, %c0_i32_43 : i32
    scf.if %146 {
      %c4 = arith.constant 4 : index
      %c0_44 = arith.constant 0 : index
      %c0_45 = arith.constant 0 : index
      %147 = vector.load %arg5[%c4, %c0_44, %c0_45] : memref<12x32x32xf32, #tpu.memory_space<vmem>>, vector<1x32x32xf32>
      %148 = vector.shape_cast %147 : vector<1x32x32xf32> to vector<32x32xf32>
      %149 = vector.extract_strided_slice %148 {offsets = [0, 0], sizes = [32, 16], strides = [1, 1]} : vector<32x32xf32> to vector<32x16xf32>
      %cst_46 = arith.constant dense<0.000000e+00> : vector<8x16xf32>
      %150 = tpu.matmul %142, %149, %cst_46 {dimension_numbers = #tpu.dot_dimension_numbers<[1], [0], [0], [1], [0, 0, 1, 1], [], []>} : vector<8x32xf32>, vector<32x16xf32>, vector<8x16xf32> -> vector<8x16xf32>
      %c5 = arith.constant 5 : index
      %c0_47 = arith.constant 0 : index
      %c0_48 = arith.constant 0 : index
      %151 = vector.load %arg5[%c5, %c0_47, %c0_48] : memref<12x32x32xf32, #tpu.memory_space<vmem>>, vector<1x32x32xf32>
      %152 = vector.shape_cast %151 : vector<1x32x32xf32> to vector<32x32xf32>
      %153 = vector.extract_strided_slice %152 {offsets = [0, 0], sizes = [1, 16], strides = [1, 1]} : vector<32x32xf32> to vector<1x16xf32>
      %154 = vector.broadcast %153 : vector<1x16xf32> to vector<8x16xf32>
      %155 = arith.addf %150, %154 : vector<8x16xf32>
      %cst_49 = arith.constant 0.000000e+00 : f32
      %156 = vector.broadcast %cst_49 : f32 to vector<8x16xf32>
      %157 = arith.maximumf %155, %156 : vector<8x16xf32>
      %c6 = arith.constant 6 : index
      %c0_50 = arith.constant 0 : index
      %c0_51 = arith.constant 0 : index
      %158 = vector.load %arg5[%c6, %c0_50, %c0_51] : memref<12x32x32xf32, #tpu.memory_space<vmem>>, vector<1x32x32xf32>
      %159 = vector.shape_cast %158 : vector<1x32x32xf32> to vector<32x32xf32>
      %160 = vector.extract_strided_slice %159 {offsets = [0, 0], sizes = [16, 1], strides = [1, 1]} : vector<32x32xf32> to vector<16x1xf32>
      %cst_52 = arith.constant dense<0.000000e+00> : vector<8x1xf32>
      %161 = tpu.matmul %157, %160, %cst_52 {dimension_numbers = #tpu.dot_dimension_numbers<[1], [0], [0], [1], [0, 0, 1, 1], [], []>} : vector<8x16xf32>, vector<16x1xf32>, vector<8x1xf32> -> vector<8x1xf32>
      %c7 = arith.constant 7 : index
      %c0_53 = arith.constant 0 : index
      %c0_54 = arith.constant 0 : index
      %162 = vector.load %arg5[%c7, %c0_53, %c0_54] : memref<12x32x32xf32, #tpu.memory_space<vmem>>, vector<1x32x32xf32>
      %163 = vector.shape_cast %162 : vector<1x32x32xf32> to vector<32x32xf32>
      %164 = vector.extract_strided_slice %163 {offsets = [0, 0], sizes = [1, 1], strides = [1, 1]} : vector<32x32xf32> to vector<1x1xf32>
      %165 = vector.broadcast %164 : vector<1x1xf32> to vector<8x1xf32>
      %166 = arith.addf %161, %165 : vector<8x1xf32>
      %167 = tpu.iota {dimensions = array<i32: 0>} : vector<8x8xi32>
      %168 = tpu.iota {dimensions = array<i32: 1>} : vector<8x8xi32>
      %169 = arith.cmpi eq, %167, %168 : vector<8x8xi32>
      %170 = arith.extui %169 : vector<8x8xi1> to vector<8x8xi32>
      %171 = arith.sitofp %170 : vector<8x8xi32> to vector<8x8xf32>
      %172 = vector.broadcast %166 : vector<8x1xf32> to vector<8x8xf32>
      %173 = arith.mulf %172, %171 : vector<8x8xf32>
      %cst_55 = arith.constant dense<0.000000e+00> : vector<8xf32>
      %174 = vector.multi_reduction <add>, %173, %cst_55 [0] : vector<8x8xf32> to vector<8xf32>
      %175 = vector.shape_cast %174 : vector<8xf32> to vector<1x8xf32>
      %c8 = arith.constant 8 : index
      %c0_56 = arith.constant 0 : index
      %c0_57 = arith.constant 0 : index
      %176 = vector.load %arg5[%c8, %c0_56, %c0_57] : memref<12x32x32xf32, #tpu.memory_space<vmem>>, vector<1x32x32xf32>
      %177 = vector.shape_cast %176 : vector<1x32x32xf32> to vector<32x32xf32>
      %178 = vector.extract_strided_slice %177 {offsets = [0, 0], sizes = [8, 6], strides = [1, 1]} : vector<32x32xf32> to vector<8x6xf32>
      %cst_58 = arith.constant dense<0.000000e+00> : vector<1x6xf32>
      %179 = tpu.matmul %175, %178, %cst_58 {dimension_numbers = #tpu.dot_dimension_numbers<[1], [0], [0], [1], [0, 0, 1, 1], [], []>} : vector<1x8xf32>, vector<8x6xf32>, vector<1x6xf32> -> vector<1x6xf32>
      %c9 = arith.constant 9 : index
      %c0_59 = arith.constant 0 : index
      %c0_60 = arith.constant 0 : index
      %180 = vector.load %arg5[%c9, %c0_59, %c0_60] : memref<12x32x32xf32, #tpu.memory_space<vmem>>, vector<1x32x32xf32>
      %181 = vector.shape_cast %180 : vector<1x32x32xf32> to vector<32x32xf32>
      %182 = vector.extract_strided_slice %181 {offsets = [0, 0], sizes = [1, 6], strides = [1, 1]} : vector<32x32xf32> to vector<1x6xf32>
      %183 = arith.addf %179, %182 : vector<1x6xf32>
      %cst_61 = arith.constant 0.000000e+00 : f32
      %184 = vector.broadcast %cst_61 : f32 to vector<1x6xf32>
      %185 = arith.maximumf %183, %184 : vector<1x6xf32>
      %c10 = arith.constant 10 : index
      %c0_62 = arith.constant 0 : index
      %c0_63 = arith.constant 0 : index
      %186 = vector.load %arg5[%c10, %c0_62, %c0_63] : memref<12x32x32xf32, #tpu.memory_space<vmem>>, vector<1x32x32xf32>
      %187 = vector.shape_cast %186 : vector<1x32x32xf32> to vector<32x32xf32>
      %188 = vector.extract_strided_slice %187 {offsets = [0, 0], sizes = [6, 4], strides = [1, 1]} : vector<32x32xf32> to vector<6x4xf32>
      %cst_64 = arith.constant dense<0.000000e+00> : vector<1x4xf32>
      %189 = tpu.matmul %185, %188, %cst_64 {dimension_numbers = #tpu.dot_dimension_numbers<[1], [0], [0], [1], [0, 0, 1, 1], [], []>} : vector<1x6xf32>, vector<6x4xf32>, vector<1x4xf32> -> vector<1x4xf32>
      %c11 = arith.constant 11 : index
      %c0_65 = arith.constant 0 : index
      %c0_66 = arith.constant 0 : index
      %190 = vector.load %arg5[%c11, %c0_65, %c0_66] : memref<12x32x32xf32, #tpu.memory_space<vmem>>, vector<1x32x32xf32>
      %191 = vector.shape_cast %190 : vector<1x32x32xf32> to vector<32x32xf32>
      %192 = vector.extract_strided_slice %191 {offsets = [0, 0], sizes = [1, 4], strides = [1, 1]} : vector<32x32xf32> to vector<1x4xf32>
      %193 = arith.addf %189, %192 : vector<1x4xf32>
      %c0_67 = arith.constant 0 : index
      %c0_68 = arith.constant 0 : index
      %c0_69 = arith.constant 0 : index
      %194 = vector.load %arg12[%c0_67, %c0_68, %c0_69] : memref<1x1x4xf32, #tpu.memory_space<vmem>>, vector<1x1x4xf32>
      %195 = vector.shape_cast %194 : vector<1x1x4xf32> to vector<1x4xf32>
      %196 = vector.shape_cast %193 : vector<1x4xf32> to vector<1x1x4xf32>
      tpu.vector_store %arg12[%c0_67, %c0_68, %c0_69], %196 {strides = array<i32>} : memref<1x1x4xf32, #tpu.memory_space<vmem>>, vector<1x1x4xf32>,
    } else {
    }
    return
  }
  func.func @transform_0(%arg0: i32, %arg1: i32) -> (i32, i32, i32) {
    %c0_i32 = arith.constant 0 : i32
    %c0_i32_0 = arith.constant 0 : i32
    %c0_i32_1 = arith.constant 0 : i32
    return %arg0, %c0_i32, %c0_i32_0 : i32, i32, i32
  }
  func.func @transform_1(%arg0: i32, %arg1: i32) -> (i32, i32, i32) {
    %c0_i32 = arith.constant 0 : i32
    %c0_i32_0 = arith.constant 0 : i32
    %c0_i32_1 = arith.constant 0 : i32
    return %arg0, %c0_i32, %c0_i32_0 : i32, i32, i32
  }
  func.func @transform_2(%arg0: i32, %arg1: i32) -> (i32, i32) {
    %c0_i32 = arith.constant 0 : i32
    %c0_i32_0 = arith.constant 0 : i32
    %c0_i32_1 = arith.constant 0 : i32
    return %c0_i32, %c0_i32_0 : i32, i32
  }
  func.func @transform_3(%arg0: i32, %arg1: i32) -> (i32, i32, i32) {
    %c0_i32 = arith.constant 0 : i32
    %c0_i32_0 = arith.constant 0 : i32
    %c0_i32_1 = arith.constant 0 : i32
    %c0_i32_2 = arith.constant 0 : i32
    return %c0_i32, %c0_i32_0, %c0_i32_1 : i32, i32, i32
  }
  func.func @transform_4(%arg0: i32, %arg1: i32) -> (i32, i32, i32) {
    %c0_i32 = arith.constant 0 : i32
    %c0_i32_0 = arith.constant 0 : i32
    %c0_i32_1 = arith.constant 0 : i32
    return %arg1, %c0_i32, %c0_i32_0 : i32, i32, i32
  }
  func.func @transform_5(%arg0: i32, %arg1: i32) -> (i32, i32, i32) {
    %c0_i32 = arith.constant 0 : i32
    %c0_i32_0 = arith.constant 0 : i32
    %c0_i32_1 = arith.constant 0 : i32
    return %arg1, %c0_i32, %c0_i32_0 : i32, i32, i32
  }
  func.func @transform_6(%arg0: i32, %arg1: i32) -> (i32, i32, i32) {
    %c0_i32 = arith.constant 0 : i32
    %c0_i32_0 = arith.constant 0 : i32
    %c0_i32_1 = arith.constant 0 : i32
    return %arg1, %c0_i32, %c0_i32_0 : i32, i32, i32
  }
  func.func @transform_7(%arg0: i32, %arg1: i32) -> (i32, i32, i32) {
    %c0_i32 = arith.constant 0 : i32
    %c0_i32_0 = arith.constant 0 : i32
    %c0_i32_1 = arith.constant 0 : i32
    return %arg1, %c0_i32, %c0_i32_0 : i32, i32, i32
  }
  func.func @transform_8(%arg0: i32, %arg1: i32) -> (i32, i32, i32) {
    %c0_i32 = arith.constant 0 : i32
    %c0_i32_0 = arith.constant 0 : i32
    %c0_i32_1 = arith.constant 0 : i32
    return %arg1, %c0_i32, %c0_i32_0 : i32, i32, i32
  }
  func.func @transform_9(%arg0: i32, %arg1: i32) -> (i32, i32, i32) {
    %c0_i32 = arith.constant 0 : i32
    %c0_i32_0 = arith.constant 0 : i32
    %c0_i32_1 = arith.constant 0 : i32
    return %arg1, %c0_i32, %c0_i32_0 : i32, i32, i32
  }
  func.func @transform_10(%arg0: i32, %arg1: i32) -> (i32, i32, i32) {
    %c0_i32 = arith.constant 0 : i32
    %c0_i32_0 = arith.constant 0 : i32
    %c0_i32_1 = arith.constant 0 : i32
    return %arg0, %c0_i32, %c0_i32_0 : i32, i32, i32
  }
}

</mosaic_0001>

<bundles_post_ra>
// kernel: tf_model_forward.1
= control target key start
LH: loop header
LB: loop body
LE: loop exit
PB: predicated region body
PF: predicated region fallthrough
CT: control target
= control target key end

     0   :  { %s5714_s0 = inlined_call_operand.vmem [shape: f32[2,8,1], index: 0, kind: input, shape index: {}]   ;;  %s5715_s1 = inlined_call_operand.vmem [shape: f32[2,1,32], index: 1, kind: input, shape index: {}]   ;;  %s5716_s2 = inlined_call_operand.vmem [shape: f32[8,8], index: 2, kind: input, shape index: {}]   ;;  %s5717_s3 = inlined_call_operand.vmem [shape: f32[12,32,32], index: 3, kind: input, shape index: {}]   ;;  %s5718_s4 = inlined_call_operand.vmem [shape: f32[2,8,128], index: 4, kind: input, shape index: {}]   ;;  %s5719_s5 = inlined_call_operand.vmem [shape: f32[2,32,96], index: 5, kind: input, shape index: {}]   ;;  %s5720_s6 = inlined_call_operand.vmem [shape: f32[2,32,32], index: 6, kind: input, shape index: {}]   ;;  %s5721_s7 = inlined_call_operand.vmem [shape: bf16[2,32,2048], index: 7, kind: input, shape index: {}]   ;;  %s5722_s8 = inlined_call_operand.vmem [shape: f32[2,1,2048], index: 8, kind: input, shape index: {}]   ;;  %s5723_s9 = inlined_call_operand.vmem [shape: bf16[2,2048,32], index: 9, kind: input, shape index: {}]   ;;  %s5724_s10 = inlined_call_operand.hbm [shape: f32[2,1,4], index: 10, kind: output, shape index: {}]  }
   0x1   :  { %5737 = sst [smem:[#allocation17_spill]] %s5714_s0 }
   0x2   :  { %5738 = sst [smem:[#allocation18_spill]] %s5718_s4 }
   0x3   :  { %5739 = sst [smem:[#allocation19_spill]] %s5724_s10 }
   0x4   :  { %15 = vsyncpa [#allocation4], 0 }
   0x5   :  { %17 = vsyncpa [#allocation4 + $0x1], 0  ;;  %s5070_s13 = smov 0   ;;  %s5072_s14 = smov 0  }
   0x6   :  { %s5074_s15 = smov 0   ;;  %s5076_s16 = smov 0  }
   0x7   :  { %s5078_s17 = smov 0   ;;  %s5080_s18 = smov 0  }
   0x8   :  { %s5082_s19 = smov 0   ;;  %s5084_s20 = smov 0  }
   0x9 LB: > { %5740 = sst [smem:[#allocation6_spill]] %s4965_s13  ;;  %s4081_s21 = sadd.s32 4294967295, %s4993_s20   ;;  %s4993_s20 = sphi %s5084_s20, %s23_s20   ;;  %s4989_s19 = sphi %s5082_s19, %s5770_s19   ;;  %s4985_s18 = sphi %s5080_s18, %s5769_s18   ;;  %s4981_s17 = sphi %s5078_s17, %s5768_s17   ;;  %s4977_s16 = sphi %s5076_s16, %s5773_s16   ;;  %s4973_s15 = sphi %s5074_s15, %s5766_s15   ;;  %s4969_s14 = sphi %s5072_s14, %s5772_s14   ;;  %s4965_s13 = sphi %s5070_s13, %s5771_s13  }
   0xa   : > { %5741 = sst [smem:[#allocation7_spill]] %s4973_s15  ;;  %s4082_s22 = sadd.s32 4294967294, %s4993_s20  }
   0xb   : > { %5742 = sst [smem:[#allocation8_spill]] %s4981_s17  ;;  %s32_s23 = sadd.s32 1, %s4985_s18 }
   0xc   : > { %5743 = sst [smem:[#allocation9_spill]] %s4985_s18  ;;  %p33_p0 = scmp.ge.s32.totalorder %s32_s23, 2 }
   0xd   : > { %5744 = sst [smem:[#allocation10_spill]] %s4989_s19  ;;  %s35_s24 = sadd.s32 1, %s4989_s19 }
   0xe   : > { %5745 = sst [smem:[#allocation11_spill]] %s4993_s20  ;;  %p302_p1 = scmp.ne.s32.totalorder %s4973_s15, %s4969_s14 }
   0xf   : > { %p303_p2 = scmp.eq.s32.totalorder %s4081_s21, 3  ;;  %s5775_s23 = smov (%p33_p0, %s32_s23), 0 }
  0x10   : > { %5746 = sst [smem:[#allocation12_spill]] %s5775_s23  ;;  %s5777_s24 = smov (!%p33_p0, %s35_s24), %s4989_s19 }
  0x11   : > { %p5119_p3 = por %p303_p2, %p302_p1  ;;  %p308_p4 = scmp.ne.s32.totalorder %s4969_s14, %s4965_s13 }
  0x12   : > { %p37_p5 = scmp.ge.s32.totalorder %s5777_s24, 2  ;;  %p309_p6 = scmp.eq.s32.totalorder %s4082_s22, 3 }
  0x13   : > { %s5747_s25 = scalar_select %p5119_p3, 1, 0 }
  0x14   : > { %p4085_p7 = scmp.ge.s32.totalorder %s4993_s20, 1  ;;  %p392_p8 = scmp.lt.s32.totalorder %s4993_s20, 5 }
  0x15   : > { %5748 = sst [smem:[#allocation13_spill]] %s5747_s25  ;;  %s5779_s24 = smov (%p37_p5, %s5777_s24), 0 }
  0x16   : > { %5749 = sst [smem:[#allocation14_spill]] %s5779_s24  ;;  %p5129_p9 = por %p309_p6, %p308_p4 }
  0x17   : > { %p393_p10 = pnand %p4085_p7, %p392_p8  ;;  %s289_s27 = ssub.s32 %s4989_s19, %s5779_s24 }
  0x18   : > { %s5750_s26 = scalar_select %p5129_p9, 1, 0 }
  0x19   : > { %s292_s28 = sadd.s32 1, %s4973_s15  ;;  %p290_p11 = scmp.eq.s32.totalorder %s289_s27, 0 }
  0x1a   : > { %5751 = sst [smem:[#allocation15_spill]] %s5750_s26  ;;  %396 = sbr.rel (%p393_p10) target bundleno = 4207 (0x106f), region = 60 }
  0x1b   : > { %s5137_s29 = scalar_select %p290_p11, %s4973_s15, %s292_s28  }
  0x1c   : > { %p459_p12 = scmp.lt.s32.totalorder (!%p393_p10), %s4981_s17, 1  ;;  %p466_p13 = scmp.lt.s32.totalorder (!%p393_p10), %s4977_s16, 1 }
  0x1d   : > { %5752 = sst [smem:[#allocation16_spill]] %s5137_s29  ;;  %s5754_s4 = sld [smem:[#allocation18_spill]] (!%p393_p10) }
  0x1e   : > { %s5753_s0 = sld [smem:[#allocation17_spill]] (!%p393_p10)  ;;  %p4097_p0 = scmp.ne.s32.totalorder (!%p393_p10), %s4977_s16, 0 }
  0x21   : > { %s5143_s11 = scalar_select %p459_p12, %s4981_s17, 1 }
  0x22   : > { %s467_s12 = scalar_select %p466_p13, %s4977_s16, 1 }
  0x23   : > { %s4086_s21 = sshll.u32 %s5143_s11, 3  ;;  %s5755_s17 = sand.u32 1, %s4969_s14   ;;  %v500_v0 = vld [vmem:[%s5717_s3] sm:$0xff] (!%p4097_p0)  ;;  %vm511_vm0 = vcmask (!%p4097_p0), 1040384   ;;  %vm507_vm1 = vcmask (!%p4097_p0), 7168   ;;  %v4995_v2 = vmov (!%p4097_p0), 0.0   ;;  %v503_v7 = vlaneseq (!%p4097_p0) }
  0x24   : > { %s462_s19 = scalar_lea.vmem %s5753_s0, %s4086_s21  ;;  %s4087_s18 = sshll.u32 %s467_s12, 3  ;;  %4533 = vmatprep.subr.mxu0 (!%p4097_p0), %v4995_v2  ;;  %vm4996_vm2 = vmmov (!%p4097_p0), 0   ;;  %v4101_v3 = vld [vmem:[%s5717_s3 + $0x40] sm:$0xff] (!%p4097_p0)  ;;  %v4102_v4 = vld [vmem:[%s5717_s3 + $0x48] sm:$0xff] (!%p4097_p0)  ;;  %v4997_v6 = vmov (!%p4097_p0), 0.0|0.0   ;;  %vm595_vm3 = vcmask (!%p4097_p0), 130048  }
  0x25   : > { %s5157_s15 = scalar_lea.vmem %s5754_s4, %s4087_s18  ;;  %s4310_s26 = sshll.u32 %s467_s12, 5  ;;  %v499_v1 = vld [vmem:[%s462_s19] sm:$0xff] (!%p4097_p0)  ;;  %4535 = vmatprep.mubr.msk.f32.mxu0 (!%p4097_p0), %vm4996_vm2, %v4995_v2  ;;  %4534 = vmatpush3.msk.msra.mxu0 (!%p4097_p0), %vm511_vm0, %v500_v0  ;;  %v4636_v5 = vpack.c.bf16 (!%p4097_p0), %v4102_v4, %v4101_v3  ;;  %v504_v8 = vshrl.u32 (!%p4097_p0), %v503_v7, 7  ;;  %vm677_vm4 = vcmask (!%p4097_p0), 261120  }
  0x26   : > { %s5162_s10 = scalar_lea.vmem %s5719_s5, %s4310_s26  ;;  %s5167_s22 = scalar_lea.vmem %s5720_s6, %s4310_s26  ;;  %4542 = vmatprep.mubr.msk.f32.mxu1 (!%p4097_p0), %vm4996_vm2, %v4995_v2  ;;  %4536 = vmatmul.mubr.msk.f32.vlgmr.msra.gmra.mrb[0].mxu0 (!%p4097_p0), %vm507_vm1, %v499_v1  ;;  %v4098_v10 = vld [vmem:[%s5717_s3 + $0x20] sm:$0xff] (!%p4097_p0) }
  0x27   : > { %s4312_s27 = sshll.u32 %s467_s12, 8  ;;  %s4094_s23 = sshll.u32 %s467_s12, 4  ;;  %4635 = vmatprep.subr.bf16.mxu1 (!%p4097_p0), %v4997_v6  ;;  %v505_v9 = vsub.s32 (!%p4097_p0), 0, %v504_v8  ;;  %v4103_v16 = vld [vmem:[%s5717_s3 + $0x60] sm:$0xff] (!%p4097_p0) }
  0x28   : > { %s5172_s28 = scalar_lea.vmem %s5721_s7, %s4312_s27  ;;  %s5177_s30 = scalar_lea.vmem %s5722_s8, %s4094_s23  ;;  %4637 = vmatpush3.bf16.msra.mxu1 (!%p4097_p0), %v4636_v5 }
  0x29   : > { %s4313_s13 = sshll.u32 %s467_s12, 10  ;;  %s5186_s25 = scalar_lea.vmem [#allocation3], %s5755_s17  ;;  %v506_v11 = vrot.slane (!%p4097_p0), %v4098_v10, %v505_v9  ;;  %v594_v17 = vrot.slane (!%p4097_p0), %v4103_v16, %v505_v9 }
  0x2a   : > { %s5182_s4 = scalar_lea.vmem %s5723_s9, %s4313_s13  ;;  %498 = sbr.rel (%p4097_p0) target bundleno = 471 (0x1d7), region = 64 }
  0x2b   : > { %s5756_s17 = scalar_lea.vmem (!%p4097_p0), %s5715_s1, %s5143_s11 }
  0x2c   : > { %v4105_v19 = vld [vmem:[%s5756_s17] ss:$0 sm:$0xff] (!%p4097_p0) }
  0xf9   : > { %v581_v12 = vpop.f32.mrb[0].mxu0 }
  0xfa   : > { %v582_v13 = vadd.f32 %v581_v12, %v506_v11  ;;  %v4537_v14 = vpop.f32.mrb[1].mxu0 }
  0xfc   : > { %v585_v15 = vmax.f32 %v582_v13, 0.0 }
  0xfe   : > { %4543 = vmatmul.mubr.msk.f32.vlgmr.msra.gmra.mrb[0].mxu1 %vm595_vm3, %v585_v15 }
 0x1d1   : > { %v665_v18 = vpop.f32.mrb[0].mxu1 }
 0x1d2   : > { %v666_v20 = vadd.f32 %v665_v18, %v594_v17  ;;  %v4544_v21 = vpop.f32.mrb[1].mxu1 }
 0x1d4   : > { %v676_v22 = vadd.f32 %v4105_v19, %v666_v20 }
 0x1d6   : > { %678 = vst.msk [vmem:[#allocation2] sm:$0xff] %vm677_vm4, %v676_v22 }
 0x1d7 PF: > { %v681_v23 = vld [vmem:[%s5162_s10] sm:$0xff]  ;;  %v682_v24 = vld [vmem:[%s5162_s10 + $0x8] sm:$0xff]  ;;  %v683_v25 = vld [vmem:[%s5162_s10 + $0x10] sm:$0xff]  ;;  %v4998_v26 = vmov 0.0|0.0   ;;  %vm4999_vm5 = vmmov 0   ;;  %v5000_v29 = vmov 0.0   ;;  %v685_v32 = vlaneseq }
 0x1d8   : > { %4638 = vmatprep.subr.bf16.mxu0 %v4998_v26  ;;  %v4639_v27 = vpack.c.bf16 %v682_v24, %v681_v23  ;;  %v684_v28 = vld [vmem:[%s5162_s10 + $0x18] sm:$0xff]  ;;  %4553 = vmatprep.mubr.msk.f32.mxu0 %vm4999_vm5, %v5000_v29  ;;  %vm689_vm6 = vcmask 261120   ;;  %v5234_v35 = vld [vmem:[%s5157_s15] sm:$0xff]  ;;  %s5001_s10 = smov 104   ;;  %s5002_s11 = smov 120   ;;  %vm772_vm7 = vcmask 64512  }
 0x1d9   : > { %4556 = vmatprep.subr.mxu1 %v5000_v29  ;;  %4558 = vmatprep.mubr.msk.f32.mxu1 %vm4999_vm5, %v5000_v29  ;;  %v4642_v30 = vpack.c.bf16 %v684_v28, %v683_v25  ;;  %v5228_v33 = vshrl.u32 %v685_v32, 7  ;;  %s5003_s26 = smov 96   ;;  %s5004_s27 = smov 112   ;;  %v1079_v48 = vld [vmem:[%s5716_s2] sm:$0xff]  ;;  %vm1445_vm8 = vcmask 130048   ;;  %vm1447_vm9 = vcmask 195584  }
 0x1da   : > { %4640 = vmatpush3.bf16.msra.mxu0 %v4639_v27  ;;  %s5005_s23 = smov 64   ;;  %s5006_s24 = smov 8  }
 0x1db   : > { %4641 = vmatprep.subr.bf16.mxu0 %v4998_v26  ;;  %v5231_v34 = vsub.s32 0, %v5228_v33  ;;  %s5007_s19 = smov 16   ;;  %s5008_s21 = smov 24  }
 0x1dc   : > { %p4288_p1 = scmp.ne.s32.totalorder %s4977_s16, 1 }
 0x1dd   : > { %v5220_v31 = vld [vmem:[#allocation2] sm:$0xff]  ;;  %v688_v36 = vrot.slane %v5234_v35, %v5231_v34  ;;  %vm5011_vm10 = vmmov (!%p4288_p1), 0   ;;  %vm3845_vm12 = vcmask (!%p4288_p1), 1045504   ;;  %vm3841_vm13 = vcmask (!%p4288_p1), 48128  }
 0x1de   : > { %4643 = vmatpush3.bf16.msra.mxu0 %v4642_v30  ;;  %vm3919_vm14 = vcmask (!%p4288_p1), 24576  }
 0x1df   : > { %4576 = vmatprep.subr.mxu0 %v5000_v29 }
 0x1e1   : > { %4554 = vmatmul.mubr.msk.f32.vlgmr.msra.gmra.mrb[0].mxu0 %vm689_vm6, %v5220_v31 }
 0x1e2   : > { %4578 = vmatprep.mubr.msk.f32.mxu0 %vm4999_vm5, %v5000_v29 }
 0x2b4   : > { %v759_v37 = vpop.f32.mrb[0].mxu0 }
 0x2b5   : > { %v5238_v38 = vadd.f32 %v759_v37, %v688_v36  ;;  %v4555_v39 = vpop.f32.mrb[1].mxu0 }
 0x2b7   : > { %768 = vrot.lane.b32.xlu1 %v5238_v38, %s5001_s10  ;;  %764 = vrot.lane.b32.xlu0 %v5238_v38, %s5002_s11 }
 0x2bb   : > { %770 = vrot.lane.b32.xlu1 %v5238_v38, %s5003_s26  ;;  %766 = vrot.lane.b32.xlu0 %v5238_v38, %s5004_s27 }
 0x329   : > { %v5244_v40 = vpop.permute.xlu1 %768  ;;  %v765_v41 = vpop.permute.xlu0 %764 }
 0x32a   : > { %847 = vrot.lane.b32.xlu0 %v765_v41, %s5003_s26 }
 0x32d   : > { %v771_v42 = vpop.permute.xlu1 %770  ;;  %v5246_v43 = vpop.permute.xlu0 %766 }
 0x32e   : > { %4557 = vmatpush3.xpose.msk.msra.mxu1 %vm772_vm7, %v771_v42  ;;  %999 = vrot.lane.b32.xlu0 %v5244_v40, %s5003_s26 }
 0x32f   : > { %923 = vrot.lane.b32.xlu1 %v5246_v43, %s5003_s26  ;;  %4561 = vmatprep.subr.mxu1 %v5000_v29 }
 0x331   : > { %4559 = vmatmul.mubr.msk.f32.vlgmr.msra.gmra.mrb[0].mxu1 %vm772_vm7, %v5238_v38 }
 0x332   : > { %4563 = vmatprep.mubr.msk.f32.mxu1 %vm4999_vm5, %v5000_v29 }
 0x39c   : > { %v848_v44 = vpop.permute.xlu0 %847 }
 0x39d   : > { %4562 = vmatpush3.xpose.msk.msra.mxu1 %vm772_vm7, %v848_v44 }
 0x39e   : > { %4566 = vmatprep.subr.mxu1 %v5000_v29 }
 0x3a0   : > { %4564 = vmatmul.mubr.msk.f32.vlgmr.msra.gmra.mrb[2].mxu1 %vm772_vm7, %v765_v41  ;;  %v1000_v46 = vpop.permute.xlu0 %999 }
 0x3a1   : > { %v924_v45 = vpop.permute.xlu1 %923  ;;  %4568 = vmatprep.mubr.msk.f32.mxu1 %vm4999_vm5, %v5000_v29 }
 0x3a2   : > { %4567 = vmatpush3.xpose.msk.msra.mxu1 %vm772_vm7, %v924_v45 }
 0x3a3   : > { %4571 = vmatprep.subr.mxu1 %v5000_v29 }
 0x3a5   : > { %4569 = vmatmul.mubr.msk.f32.vlgmr.msra.gmra.mrb[4].mxu1 %vm772_vm7, %v5246_v43 }
 0x3a6   : > { %4572 = vmatpush3.xpose.msk.msra.mxu1 %vm772_vm7, %v1000_v46  ;;  %4573 = vmatprep.mubr.msk.f32.mxu1 %vm4999_vm5, %v5000_v29 }
 0x3a7   : > { %4581 = vmatprep.subr.mxu1 %v5000_v29 }
 0x3a9   : > { %4574 = vmatmul.mubr.msk.f32.vlgmr.msra.gmra.mrb[6].mxu1 %vm772_vm7, %v5244_v40 }
 0x3aa   : > { %4583 = vmatprep.mubr.msk.f32.mxu1 %vm4999_vm5, %v5000_v29 }
 0x404   : > { %v843_v47 = vpop.f32.mrb[0].mxu1 }
 0x405   : > { %v1075_v49 = vmul.f32 0.35355338, %v843_v47  ;;  %v4560_v50 = vpop.f32.mrb[1].mxu1 }
 0x406   : > { %v1450_v50 = vld [vmem:[%s5167_s22 + $0x8] sm:$0xff] }
 0x407   : > { %v1080_v51 = vadd.f32 %v1079_v48, %v1075_v49  ;;  %v1449_v49 = vld [vmem:[%s5167_s22] sm:$0xff] }
 0x409   : > { %v1084_v52 = vsel %vm772_vm7, %v1080_v51, -inf }
 0x40a   : > { %1085 = vmax.xlane.f32.xlu1 %v1084_v52  ;;  %v1451_v52 = vld [vmem:[%s5167_s22 + $0x10] sm:$0xff] }
 0x473   : > { %v919_v53 = vpop.f32.mrb[2].mxu1 }
 0x474   : > { %v1076_v54 = vmul.f32 0.35355338, %v919_v53  ;;  %v4565_v55 = vpop.f32.mrb[3].mxu1  ;;  %v1452_v53 = vld [vmem:[%s5167_s22 + $0x18] sm:$0xff] }
 0x476   : > { %v1081_v56 = vadd.f32 %v1079_v48, %v1076_v54  ;;  %v4648_v54 = vpack.c.bf16 %v1452_v53, %v1451_v52 }
 0x478   : > { %v995_v57 = vpop.f32.mrb[4].mxu1  ;;  %v1087_v58 = vsel %vm772_vm7, %v1081_v56, -inf }
 0x479   : > { %v1077_v59 = vmul.f32 0.35355338, %v995_v57  ;;  %v4570_v60 = vpop.f32.mrb[5].mxu1  ;;  %1088 = vmax.xlane.f32.xlu0 %v1087_v58 }
 0x47b   : > { %v1082_v61 = vadd.f32 %v1079_v48, %v1077_v59 }
 0x47c   : > { %v1071_v62 = vpop.f32.mrb[6].mxu1 }
 0x47d   : > { %v1078_v63 = vmul.f32 0.35355338, %v1071_v62  ;;  %v4575_v0 = vpop.f32.mrb[7].mxu1  ;;  %v1090_v1 = vsel %vm772_vm7, %v1082_v61, -inf }
 0x47e   : > { %1091 = vmax.xlane.f32.xlu0 %v1090_v1  ;;  %v5313_v1 = vsub.s32 1, %v5228_v33 }
 0x47f   : > { %v1083_v2 = vadd.f32 %v1079_v48, %v1078_v63 }
 0x481   : > { %v1093_v3 = vsel %vm772_vm7, %v1083_v2, -inf }
 0x482   : > { %1094 = vmax.xlane.f32.xlu1 %v1093_v3 }
 0x493   : > { %1204 = vrot.lane.b32.xlu1 %v765_v41, %s5005_s23 }
 0x494   : > { %1128 = vrot.lane.b32.xlu0 %v5238_v38, %s5005_s23 }
 0x497   : > { %v1086_v4 = vpop.xlane.xlu1 %1085 }
 0x498   : > { %v1096_v5 = vsub.f32 %v1080_v51, %v1086_v4  ;;  %v4645_v51 = vpack.c.bf16 %v1450_v50, %v1449_v49 }
 0x49a   : > { %v1100_v6 = vmul.f32 1.442695, %v1096_v5 }
 0x49c   : > { %4877 = vpow2.f32 %v1100_v6 }
 0x4a6   : > { %v4878_v7 = vpop.eup %4877 }
 0x4a7   : > { %v1108_v8 = vsel %vm772_vm7, %v4878_v7, 0.0 }
 0x4b3   : > { %1109 = vadd.xlane.f32.xlu0 %v1108_v8 }
 0x506   : > { %v1089_v9 = vpop.xlane.xlu0 %1088 }
 0x507   : > { %v1097_v10 = vsub.f32 %v1081_v56, %v1089_v9 }
 0x509   : > { %v1102_v11 = vmul.f32 1.442695, %v1097_v10 }
 0x50b   : > { %4879 = vpow2.f32 %v1102_v11  ;;  %v1092_v12 = vpop.xlane.xlu0 %1091 }
 0x50c   : > { %v1098_v13 = vsub.f32 %v1082_v61, %v1092_v12 }
 0x50e   : > { %v1104_v14 = vmul.f32 1.442695, %v1098_v13  ;;  %v1555_v13 = vld [vmem:[%s5172_s28] sm:$0xff] }
 0x50f   : > { %v1095_v15 = vpop.xlane.xlu1 %1094  ;;  %v1129_v16 = vpop.permute.xlu0 %1128 }
 0x510   : > { %4881 = vpow2.f32 %v1104_v14  ;;  %v1099_v17 = vsub.f32 %v1083_v2, %v1095_v15  ;;  %4577 = vmatpush3.msra.mxu0 %v1129_v16  ;;  %v1456_v2 = vrot.slane %v5234_v35, %v5313_v1  ;;  %v1563_v14 = vld [vmem:[%s5172_s28 + $0x40] sm:$0xff]  ;;  %v1556_v15 = vld [vmem:[%s5172_s28 + $0x8] sm:$0xff] }
 0x511   : > { %4586 = vmatprep.subr.mxu0 %v5000_v29  ;;  %v4121_v16 = vcombine.high %v1555_v13, %v1563_v14 }
 0x512   : > { %v1106_v18 = vmul.f32 1.442695, %v1099_v17  ;;  %v1564_v17 = vld [vmem:[%s5172_s28 + $0x48] sm:$0xff] }
 0x513   : > { %v1205_v19 = vpop.permute.xlu1 %1204 }
 0x514   : > { %4883 = vpow2.f32 %v1106_v18  ;;  %4582 = vmatpush3.msra.mxu1 %v1205_v19  ;;  %v4122_v18 = vcombine.low %v1556_v15, %v1564_v17  ;;  %v4123_v19 = vcombine.high %v1556_v15, %v1564_v17  ;;  %v1570_v15 = vld [vmem:[%s5172_s28 + $0x78] sm:$0xff] }
 0x515   : > { %v4880_v20 = vpop.eup %4879  ;;  %4591 = vmatprep.subr.mxu1 %v5000_v29 }
 0x516   : > { %v1111_v21 = vsel %vm772_vm7, %v4880_v20, 0.0 }
 0x517   : > { %1112 = vadd.xlane.f32.xlu1 %v1111_v21  ;;  %v1579_v21 = vld [vmem:[%s5172_s28 + $0xc0] sm:$0xff] }
 0x51a   : > { %v4882_v22 = vpop.eup %4881 }
 0x51b   : > { %v1114_v23 = vsel %vm772_vm7, %v4882_v22, 0.0 }
 0x51c   : > { %1115 = vadd.xlane.f32.xlu0 %v1114_v23 }
 0x51e   : > { %v4884_v24 = vpop.eup %4883 }
 0x51f   : > { %v1117_v25 = vsel %vm772_vm7, %v4884_v24, 0.0 }
 0x520   : > { %1118 = vadd.xlane.f32.xlu1 %v1117_v25 }
 0x531   : > { %1280 = vrot.lane.b32.xlu1 %v5246_v43, %s5005_s23 }
 0x532   : > { %1356 = vrot.lane.b32.xlu0 %v5244_v40, %s5005_s23 }
 0x540   : > { %v1110_v27 = vpop.xlane.xlu0 %1109 }
 0x541   : > { %4885 = vrcp.f32 %v1110_v27 }
 0x54b   : > { %v4886_v28 = vpop.eup %4885 }
 0x54c   : > { %v1124_v30 = vmul.f32 %v4886_v28, %v4878_v7 }
 0x54e   : > { %4579 = vmatmul.mubr.msk.f32.vlgmr.msra.gmra.mrb[2].mxu0 %vm772_vm7, %v1124_v30  ;;  %v1557_v30 = vld [vmem:[%s5172_s28 + $0x10] sm:$0xff] }
 0x54f   : > { %4588 = vmatprep.mubr.msk.f32.mxu0 %vm4999_vm5, %v5000_v29 }
 0x5a4   : > { %v1113_v36 = vpop.xlane.xlu1 %1112 }
 0x5a5   : > { %4887 = vrcp.f32 %v1113_v36  ;;  %v1565_v36 = vld [vmem:[%s5172_s28 + $0x50] sm:$0xff] }
 0x5a9   : > { %v1116_v37 = vpop.xlane.xlu0 %1115 }
 0x5aa   : > { %4889 = vrcp.f32 %v1116_v37  ;;  %v1558_v37 = vld [vmem:[%s5172_s28 + $0x18] sm:$0xff] }
 0x5ad   : > { %v1119_v38 = vpop.xlane.xlu1 %1118  ;;  %v1357_v40 = vpop.permute.xlu0 %1356 }
 0x5ae   : > { %4891 = vrcp.f32 %v1119_v38  ;;  %v4125_v38 = vcombine.high %v1557_v30, %v1565_v36 }
 0x5af   : > { %v4888_v39 = vpop.eup %4887 }
 0x5b0   : > { %v1125_v41 = vmul.f32 %v4888_v39, %v4880_v20  ;;  %v1571_v20 = vld [vmem:[%s5172_s28 + $0x80] sm:$0xff]  ;;  %v1566_v39 = vld [vmem:[%s5172_s28 + $0x58] sm:$0xff] }
 0x5b1   : > { %v1281_v42 = vpop.permute.xlu1 %1280  ;;  %v4137_v23 = vcombine.high %v1571_v20, %v1579_v21  ;;  %v4136_v25 = vcombine.low %v1571_v20, %v1579_v21  ;;  %v1585_v20 = vld [vmem:[%s5172_s28 + $0xf0] sm:$0xff]  ;;  %v1578_v21 = vld [vmem:[%s5172_s28 + $0xb8] sm:$0xff] }
 0x5b2   : > { %4587 = vmatpush3.msra.mxu0 %v1281_v42  ;;  %4584 = vmatmul.mubr.msk.f32.vlgmr.msra.gmra.mrb[8].mxu1 %vm772_vm7, %v1125_v41  ;;  %v5009_v41 = vmov 0   ;;  %v4124_v42 = vcombine.low %v1557_v30, %v1565_v36  ;;  %v4749_v36 = vld [vmem:[%s5182_s4 + $0x40] sm:$0xff]  }
 0x5b3   : > { %4592 = vmatpush3.msra.mxu1 %v1357_v40  ;;  %4593 = vmatprep.mubr.msk.f32.mxu1 %vm4999_vm5, %v5000_v29  ;;  %v4126_v40 = vcombine.low %v1558_v37, %v1566_v39 }
 0x5b4   : > { %v4890_v43 = vpop.eup %4889  ;;  %4644 = vmatprep.subr.bf16.mxu0 %v4998_v26  ;;  %1835 = vmatprep.subr.bf16.mxu1 %v4121_v16 }
 0x5b5   : > { %v1126_v44 = vmul.f32 %v4890_v43, %v4882_v22  ;;  %v1572_v22 = vld [vmem:[%s5172_s28 + $0x88] sm:$0xff]  ;;  %v4127_v43 = vcombine.high %v1558_v37, %v1566_v39  ;;  %v4750_v37 = vld [vmem:[%s5182_s4 + $0xc0] sm:$0xff]  }
 0x5b6   : > { %v4752_v39 = vld [vmem:[%s5182_s4 + $0x80] sm:$0xff]  }
 0x5b7   : > { %4589 = vmatmul.mubr.msk.f32.vlgmr.msra.gmra.mrb[4].mxu0 %vm772_vm7, %v1126_v44 }
 0x5b8   : > { %v4892_v45 = vpop.eup %4891  ;;  %4604 = vmatprep.mubr.msk.f32.mxu0 %vm4999_vm5, %v5000_v29  ;;  %4646 = vmatpush3.bf16.msra.mxu0 %v4645_v51 }
 0x5b9   : > { %v1127_v46 = vmul.f32 %v4892_v45, %v4884_v24  ;;  %4647 = vmatprep.subr.bf16.mxu0 %v4998_v26  ;;  %v1580_v24 = vld [vmem:[%s5172_s28 + $0xc8] sm:$0xff] }
 0x5ba   : > { %v4138_v27 = vcombine.low %v1572_v22, %v1580_v24  ;;  %v4139_v28 = vcombine.high %v1572_v22, %v1580_v24  ;;  %v1586_v22 = vld [vmem:[%s5172_s28 + $0xf8] sm:$0xff] }
 0x5bb   : > { %4594 = vmatmul.mubr.msk.f32.vlgmr.msra.gmra.mrb[10].mxu1 %vm772_vm7, %v1127_v46  ;;  %v4150_v30 = vcombine.low %v1578_v21, %v1586_v22 }
 0x5bc   : > { %4649 = vmatpush3.bf16.msra.mxu0 %v4648_v54  ;;  %1867 = vmatprep.mubr.bf16.mxu1 %v5009_v41  ;;  %v1573_v54 = vld [vmem:[%s5172_s28 + $0x90] sm:$0xff] }
 0x5bd   : > { %1876 = vmatprep.subr.bf16.mxu0 %v4123_v19  ;;  %v1577_v19 = vld [vmem:[%s5172_s28 + $0xb0] sm:$0xff] }
 0x621   : > { %v1200_v47 = vpop.f32.mrb[2].mxu0 }
 0x622   : > { %v4580_v48 = vpop.f32.mrb[3].mxu0 }
 0x623   : > { %v5338_v48 = vsub.s32 3, %v5228_v33 }
 0x625   : > { %v1553_v51 = vrot.slane %v5234_v35, %v5338_v48 }
 0x685   : > { %v1276_v55 = vpop.f32.mrb[8].mxu1 }
 0x686   : > { %1433 = vrot.lane.b32.xlu1 %v1276_v55, %s5006_s24  ;;  %v4585_v56 = vpop.f32.mrb[9].mxu1  ;;  %v1581_v55 = vld [vmem:[%s5172_s28 + $0xd0] sm:$0xff] }
 0x687   : > { %v1574_v56 = vld [vmem:[%s5172_s28 + $0x98] sm:$0xff] }
 0x68a   : > { %v1352_v29 = vpop.f32.mrb[4].mxu0 }
 0x68b   : > { %1437 = vrot.lane.b32.xlu0 %v1352_v29, %s5007_s19  ;;  %v4590_v57 = vpop.f32.mrb[5].mxu0  ;;  %v1582_v29 = vld [vmem:[%s5172_s28 + $0xd8] sm:$0xff] }
 0x68e   : > { %v1428_v58 = vpop.f32.mrb[10].mxu1 }
 0x68f   : > { %1441 = vrot.lane.b32.xlu1 %v1428_v58, %s5008_s21  ;;  %v4595_v59 = vpop.f32.mrb[11].mxu1 }
 0x690   : > { %v4141_v59 = vcombine.high %v1573_v54, %v1581_v55 }
 0x6f8   : > { %v1434_v60 = vpop.permute.xlu1 %1433 }
 0x6f9   : > { %v1444_v26 = vsel %vm772_vm7, %v1200_v47, %v1434_v60  ;;  %v5335_v47 = vsub.s32 2, %v5228_v33  ;;  %v4143_v60 = vcombine.high %v1574_v56, %v1582_v29 }
 0x6fb   : > { %v1548_v49 = vrot.slane %v5234_v35, %v5335_v47  ;;  %v1568_v35 = vld [vmem:[%s5172_s28 + $0x68] sm:$0xff] }
 0x6fd   : > { %v1438_v61 = vpop.permute.xlu0 %1437 }
 0x6fe   : > { %v1446_v62 = vsel %vm1445_vm8, %v1444_v26, %v1438_v61  ;;  %v1559_v61 = vld [vmem:[%s5172_s28 + $0x20] sm:$0xff] }
 0x6ff   : > { %v1567_v26 = vld [vmem:[%s5172_s28 + $0x60] sm:$0xff] }
 0x701   : > { %v1442_v63 = vpop.permute.xlu1 %1441 }
 0x702   : > { %v1448_v0 = vsel %vm1447_vm9, %v1446_v62, %v1442_v63  ;;  %v1560_v62 = vld [vmem:[%s5172_s28 + $0x28] sm:$0xff]  ;;  %v4140_v63 = vcombine.low %v1573_v54, %v1581_v55  ;;  %v4765_v54 = vld [vmem:[%s5182_s4 + $0x60] sm:$0xff]  }
 0x703   : > { %4605 = vmatmul.mubr.msk.f32.vlgmr.msra.gmra.mrb[6].mxu0 %vm689_vm6, %v1448_v0  ;;  %v4142_v0 = vcombine.low %v1574_v56, %v1582_v29  ;;  %v4766_v55 = vld [vmem:[%s5182_s4 + $0xe0] sm:$0xff]  }
 0x704   : > { %1877 = vmatpush1.bf16.msra.mxu0 %v4122_v18  ;;  %1908 = vmatprep.mubr.bf16.mxu0 %v5009_v41  ;;  %v4767_v56 = vld [vmem:[%s5182_s4 + $0x20] sm:$0xff]  }
 0x705   : > { %1878 = vmatprep.subr.bf16.mxu0 %v4139_v28  ;;  %v4148_v28 = vcombine.low %v1577_v19, %v1585_v20  ;;  %v4768_v29 = vld [vmem:[%s5182_s4 + $0xa0] sm:$0xff]  }
 0x708   : > { %1879 = vmatpush1.bf16.msra.mxu0 %v4138_v27  ;;  %v4151_v27 = vcombine.high %v1578_v21, %v1586_v22 }
 0x709   : > { %1958 = vmatprep.subr.bf16.mxu0 %v4127_v43  ;;  %v4756_v43 = vld [vmem:[%s5182_s4 + $0x88] sm:$0xff]  }
 0x7d6   : > { %v1526_v3 = vpop.f32.mrb[6].mxu0 }
 0x7d7   : > { %v1527_v4 = vadd.f32 %v1526_v3, %v1456_v2  ;;  %v4606_v5 = vpop.f32.mrb[7].mxu0  ;;  %v4129_v2 = vcombine.high %v1559_v61, %v1567_v26  ;;  %v4131_v3 = vcombine.high %v1560_v62, %v1568_v35 }
 0x7d8   : > { %v1583_v5 = vld [vmem:[%s5172_s28 + $0xe0] sm:$0xff] }
 0x7d9   : > { %v1530_v6 = vadd.f32 %v1527_v4, %v5220_v31  ;;  %v4120_v31 = vcombine.low %v1555_v13, %v1563_v14  ;;  %v1575_v4 = vld [vmem:[%s5172_s28 + $0xa0] sm:$0xff]  ;;  %v1569_v13 = vld [vmem:[%s5172_s28 + $0x70] sm:$0xff]  ;;  %v1562_v14 = vld [vmem:[%s5172_s28 + $0x38] sm:$0xff] }
 0x7da   : > { %v4144_v16 = vcombine.low %v1575_v4, %v1583_v5  ;;  %v4135_v18 = vcombine.high %v1562_v14, %v1570_v15  ;;  %v4134_v24 = vcombine.low %v1562_v14, %v1570_v15 }
 0x7db   : > { %v1531_v7 = vsel %vm689_vm6, %v1530_v6, 0.0  ;;  %1836 = vmatpush1.bf16.msra.mxu1 %v4120_v31 }
 0x7dc   : > { %1532 = vadd.xlane.f32.xlu0 %v1531_v7  ;;  %1837 = vmatprep.subr.bf16.mxu1 %v4137_v23  ;;  %v1584_v7 = vld [vmem:[%s5172_s28 + $0xe8] sm:$0xff] }
 0x7df   : > { %1838 = vmatpush1.bf16.msra.mxu1 %v4136_v25  ;;  %v4149_v25 = vcombine.high %v1577_v19, %v1585_v20 }
 0x7e0   : > { %1917 = vmatprep.subr.bf16.mxu1 %v4125_v38  ;;  %v4751_v38 = vld [vmem:[%s5182_s4] sm:$0xff]  }
 0x869   : > { %v1533_v8 = vpop.xlane.xlu0 %1532 }
 0x86a   : > { %v1535_v9 = vmul.f32 0.03125, %v1533_v8  ;;  %v4128_v8 = vcombine.low %v1559_v61, %v1567_v26  ;;  %v4772_v61 = vld [vmem:[%s5182_s4 + $0xa8] sm:$0xff]   ;;  %v4773_v26 = vld [vmem:[%s5182_s4 + $0x70] sm:$0xff]  }
 0x86c   : > { %v1536_v10 = vsub.f32 %v1530_v6, %v1535_v9  ;;  %v1576_v6 = vld [vmem:[%s5172_s28 + $0xa8] sm:$0xff]  ;;  %v4130_v9 = vcombine.low %v1560_v62, %v1568_v35  ;;  %v4774_v62 = vld [vmem:[%s5182_s4 + $0xf0] sm:$0xff]  }
 0x86d   : > { %v4146_v17 = vcombine.low %v1576_v6, %v1584_v7  ;;  %v4775_v35 = vld [vmem:[%s5182_s4 + $0x30] sm:$0xff]  }
 0x86e   : > { %v1537_v11 = vmul.f32 %v1536_v10, %v1536_v10 }
 0x870   : > { %v1538_v12 = vsel %vm689_vm6, %v1537_v11, 0.0  ;;  %v4147_v11 = vcombine.high %v1576_v6, %v1584_v7  ;;  %v4782_v6 = vld [vmem:[%s5182_s4 + $0x1c0] sm:$0xff]   ;;  %v5427_v7 = vsub.s32 6, %v5228_v33 }
 0x871   : > { %1539 = vadd.xlane.f32.xlu1 %v1538_v12  ;;  %v1561_v12 = vld [vmem:[%s5172_s28 + $0x30] sm:$0xff] }
 0x872   : > { %v4133_v31 = vcombine.high %v1561_v12, %v1569_v13  ;;  %v4132_v23 = vcombine.low %v1561_v12, %v1569_v13 }
 0x8fe   : > { %v1540_v44 = vpop.xlane.xlu1 %1539 }
 0x8ff   : > { %v1541_v45 = vmul.f32 0.03125, %v1540_v44  ;;  %v4757_v44 = vld [vmem:[%s5182_s4 + $0x50] sm:$0xff]  }
 0x901   : > { %v1542_v46 = vadd.f32 1e-05, %v1541_v45  ;;  %v4758_v45 = vld [vmem:[%s5182_s4 + $0xd0] sm:$0xff]  }
 0x903   : > { %4893 = vrsqrt.f32 %v1542_v46  ;;  %v4759_v46 = vld [vmem:[%s5182_s4 + $0x10] sm:$0xff]  }
 0x90d   : > { %v4894_v50 = vpop.eup %4893 }
 0x90e   : > { %v1544_v52 = vmul.f32 %v4894_v50, %v1536_v10  ;;  %v4145_v10 = vcombine.high %v1575_v4, %v1583_v5  ;;  %v4761_v50 = vld [vmem:[%s5182_s4 + $0x58] sm:$0xff]   ;;  %v4781_v5 = vld [vmem:[%s5182_s4 + $0x140] sm:$0xff]  }
 0x90f   : > { %v4780_v4 = vld [vmem:[%s5182_s4 + $0xb8] sm:$0xff]  }
 0x910   : > { %v1549_v53 = vmul.f32 %v1548_v49, %v1544_v52  ;;  %v4760_v49 = vld [vmem:[%s5182_s4 + $0x90] sm:$0xff]   ;;  %v4763_v52 = vld [vmem:[%s5182_s4 + $0x18] sm:$0xff]  }
 0x912   : > { %v5348_v57 = vadd.f32 %v1553_v51, %v1549_v53  ;;  %v4762_v51 = vld [vmem:[%s5182_s4 + $0xd8] sm:$0xff]  }
 0x913   : > { %v4764_v53 = vld [vmem:[%s5182_s4 + $0x98] sm:$0xff]  }
 0x914   : > { %v5352_v58 = vpack.c.bf16 %v5348_v57, %v5348_v57 }
 0x916   : > { %4152 = vmatmul.mubr.msk.bf16.vlgmr.msra.gmra.mrb[12].mxu1 %vm689_vm6, %v5352_v58  ;;  %4153 = vmatmul.mubr.msk.bf16.vlgmr.msra.gmra.mrb[8].mxu0 %vm689_vm6, %v5352_v58 }
 0x917   : > { %1918 = vmatpush1.bf16.msra.mxu1 %v4124_v42  ;;  %1959 = vmatpush1.bf16.msra.mxu0 %v4126_v40  ;;  %v4753_v42 = vld [vmem:[%s5182_s4 + $0x48] sm:$0xff]  }
 0x918   : > { %1919 = vmatprep.subr.bf16.mxu1 %v4141_v59  ;;  %1960 = vmatprep.subr.bf16.mxu0 %v4143_v60  ;;  %v4754_v40 = vld [vmem:[%s5182_s4 + $0xc8] sm:$0xff]  }
 0x919   : > { %1949 = vmatprep.mubr.bf16.mxu1 %v5009_v41  ;;  %1990 = vmatprep.mubr.bf16.mxu0 %v5009_v41  ;;  %v4770_v59 = vld [vmem:[%s5182_s4 + $0xe8] sm:$0xff]  }
 0x91a   : > { %v4771_v60 = vld [vmem:[%s5182_s4 + $0x28] sm:$0xff]  }
 0x91b   : > { %1920 = vmatpush1.bf16.msra.mxu1 %v4140_v63  ;;  %1961 = vmatpush1.bf16.msra.mxu0 %v4142_v0  ;;  %v4776_v63 = vld [vmem:[%s5182_s4 + $0xb0] sm:$0xff]   ;;  %v4777_v0 = vld [vmem:[%s5182_s4 + $0x78] sm:$0xff]  }
 0x91c   : > { %1999 = vmatprep.subr.bf16.mxu1 %v4129_v2  ;;  %2040 = vmatprep.subr.bf16.mxu0 %v4131_v3  ;;  %v4778_v2 = vld [vmem:[%s5182_s4 + $0xf8] sm:$0xff]  }
 0x91d   : > { %v4779_v3 = vld [vmem:[%s5182_s4 + $0x38] sm:$0xff]  }
 0x91e   : > { %4154 = vmatmul.mubr.msk.bf16.vlgmr.msra.gmra.mrb[16].mxu1 %vm689_vm6, %v5352_v58  ;;  %4155 = vmatmul.mubr.msk.bf16.vlgmr.msra.gmra.mrb[12].mxu0 %vm689_vm6, %v5352_v58 }
 0x91f   : > { %2000 = vmatpush1.bf16.msra.mxu1 %v4128_v8  ;;  %2041 = vmatpush1.bf16.msra.mxu0 %v4130_v9  ;;  %v5430_v8 = vld [vmem:[%s5177_s30 + $0x8] sm:$0xff] }
 0x920   : > { %2001 = vmatprep.subr.bf16.mxu1 %v4145_v10  ;;  %2042 = vmatprep.subr.bf16.mxu0 %v4147_v11  ;;  %v1651_v9 = vrot.slane %v5430_v8, %v5427_v7  ;;  %v5435_v10 = vld [vmem:[%s5177_s30] sm:$0xff] }
 0x921   : > { %2031 = vmatprep.mubr.bf16.mxu1 %v5009_v41  ;;  %2072 = vmatprep.mubr.bf16.mxu0 %v5009_v41  ;;  %v1595_v11 = vrot.slane %v5435_v10, %v5231_v34  ;;  %v1603_v12 = vrot.slane %v5435_v10, %v5335_v47  ;;  %v1599_v13 = vrot.slane %v5435_v10, %v5313_v1 }
 0x922   : > { %v1607_v14 = vrot.slane %v5435_v10, %v5338_v48 }
 0x923   : > { %2002 = vmatpush1.bf16.msra.mxu1 %v4144_v16  ;;  %2043 = vmatpush1.bf16.msra.mxu0 %v4146_v17 }
 0x924   : > { %2081 = vmatprep.subr.bf16.mxu1 %v4133_v31  ;;  %2122 = vmatprep.subr.bf16.mxu0 %v4135_v18 }
 0x926   : > { %4156 = vmatmul.mubr.msk.bf16.vlgmr.msra.gmra.mrb[20].mxu1 %vm689_vm6, %v5352_v58  ;;  %4157 = vmatmul.mubr.msk.bf16.vlgmr.msra.gmra.mrb[16].mxu0 %vm689_vm6, %v5352_v58 }
 0x927   : > { %2082 = vmatpush1.bf16.msra.mxu1 %v4132_v23  ;;  %2123 = vmatpush1.bf16.msra.mxu0 %v4134_v24  ;;  %v5446_v24 = vsub.s32 5, %v5228_v33 }
 0x928   : > { %2083 = vmatprep.subr.bf16.mxu1 %v4149_v25  ;;  %2124 = vmatprep.subr.bf16.mxu0 %v4151_v27  ;;  %v1622_v25 = vsub.s32 7, %v5228_v33 }
 0x929   : > { %2113 = vmatprep.mubr.bf16.mxu1 %v5009_v41  ;;  %2154 = vmatprep.mubr.bf16.mxu0 %v5009_v41  ;;  %v4755_v41 = vld [vmem:[%s5182_s4 + $0x8] sm:$0xff]  }
 0x92b   : > { %2084 = vmatpush1.bf16.msra.mxu1 %v4148_v28  ;;  %2125 = vmatpush1.bf16.msra.mxu0 %v4150_v30 }
 0x92c   : > { %4345 = vmatprep.subr.bf16.mxu1 %v4749_v36  ;;  %4367 = vmatprep.subr.bf16.mxu0 %v4750_v37 }
 0x92e   : > { %4158 = vmatmul.mubr.msk.bf16.vlgmr.msra.gmra.mrb[24].mxu1 %vm689_vm6, %v5352_v58  ;;  %4159 = vmatmul.mubr.msk.bf16.vlgmr.msra.gmra.mrb[20].mxu0 %vm689_vm6, %v5352_v58  ;;  %v4769_v58 = vld [vmem:[%s5182_s4 + $0x68] sm:$0xff]  }
 0x92f   : > { %4346 = vmatpush3.bf16.msra.mxu1 %v4751_v38  ;;  %4368 = vmatpush3.bf16.msra.mxu0 %v4752_v39 }
 0x930   : > { %4347 = vmatprep.subr.bf16.mxu1 %v4753_v42  ;;  %4369 = vmatprep.subr.bf16.mxu0 %v4754_v40  ;;  %v1615_v40 = vrot.slane %v5435_v10, %v5446_v24 }
 0x933   : > { %4348 = vmatpush3.bf16.msra.mxu1 %v4755_v41  ;;  %4370 = vmatpush3.bf16.msra.mxu0 %v4756_v43  ;;  %v1623_v41 = vrot.slane %v5435_v10, %v1622_v25  ;;  %v4783_v43 = vld [vmem:[%s5182_s4 + $0x100] sm:$0xff]  }
 0x934   : > { %4349 = vmatprep.subr.bf16.mxu1 %v4757_v44  ;;  %4371 = vmatprep.subr.bf16.mxu0 %v4758_v45  ;;  %v4784_v44 = vld [vmem:[%s5182_s4 + $0x180] sm:$0xff]  }
 0x937   : > { %4350 = vmatpush3.bf16.msra.mxu1 %v4759_v46  ;;  %4372 = vmatpush3.bf16.msra.mxu0 %v4760_v49  ;;  %v4785_v49 = vld [vmem:[%s5182_s4 + $0x148] sm:$0xff]  }
 0x938   : > { %4351 = vmatprep.subr.bf16.mxu1 %v4761_v50  ;;  %4373 = vmatprep.subr.bf16.mxu0 %v4762_v51  ;;  %v4786_v50 = vld [vmem:[%s5182_s4 + $0x1c8] sm:$0xff]  }
 0x93b   : > { %4352 = vmatpush3.bf16.msra.mxu1 %v4763_v52  ;;  %4374 = vmatpush3.bf16.msra.mxu0 %v4764_v53 }
 0x93c   : > { %4353 = vmatprep.subr.bf16.mxu1 %v4765_v54  ;;  %4375 = vmatprep.subr.bf16.mxu0 %v4766_v55 }
 0x93f   : > { %4354 = vmatpush3.bf16.msra.mxu1 %v4767_v56  ;;  %4376 = vmatpush3.bf16.msra.mxu0 %v4768_v29 }
 0x940   : > { %4355 = vmatprep.subr.bf16.mxu1 %v4769_v58  ;;  %4377 = vmatprep.subr.bf16.mxu0 %v4770_v59  ;;  %v4787_v59 = vld [vmem:[%s5182_s4 + $0x108] sm:$0xff]  }
 0x943   : > { %4356 = vmatpush3.bf16.msra.mxu1 %v4771_v60  ;;  %4378 = vmatpush3.bf16.msra.mxu0 %v4772_v61  ;;  %v4788_v60 = vld [vmem:[%s5182_s4 + $0x188] sm:$0xff]  }
 0x944   : > { %4357 = vmatprep.subr.bf16.mxu1 %v4773_v26  ;;  %4379 = vmatprep.subr.bf16.mxu0 %v4774_v62  ;;  %v4789_v62 = vld [vmem:[%s5182_s4 + $0x150] sm:$0xff]  }
 0x947   : > { %4358 = vmatpush3.bf16.msra.mxu1 %v4775_v35  ;;  %4380 = vmatpush3.bf16.msra.mxu0 %v4776_v63  ;;  %v4790_v35 = vld [vmem:[%s5182_s4 + $0x1d0] sm:$0xff]  }
 0x948   : > { %4359 = vmatprep.subr.bf16.mxu1 %v4777_v0  ;;  %4381 = vmatprep.subr.bf16.mxu0 %v4778_v2 }
 0x94b   : > { %4360 = vmatpush3.bf16.msra.mxu1 %v4779_v3  ;;  %4382 = vmatpush3.bf16.msra.mxu0 %v4780_v4  ;;  %v4791_v4 = vld [vmem:[%s5182_s4 + $0x110] sm:$0xff]  }
 0x94c   : > { %4389 = vmatprep.subr.bf16.mxu1 %v4781_v5  ;;  %4411 = vmatprep.subr.bf16.mxu0 %v4782_v6  ;;  %v4792_v5 = vld [vmem:[%s5182_s4 + $0x190] sm:$0xff]   ;;  %v4793_v6 = vld [vmem:[%s5182_s4 + $0x158] sm:$0xff]  }
 0x9e9   : > { %v1869_v15 = vpop.f32.mrb[12].mxu1  ;;  %v1910_v16 = vpop.f32.mrb[8].mxu0 }
 0x9ea   : > { %v1870_v17 = vadd.f32 %v1869_v15, %v1595_v11  ;;  %v1911_v31 = vadd.f32 %v1910_v16, %v1603_v12  ;;  %v1871_v18 = vpop.f32.mrb[13].mxu1  ;;  %v1912_v19 = vpop.f32.mrb[9].mxu0  ;;  %v4794_v11 = vld [vmem:[%s5182_s4 + $0x1d8] sm:$0xff]  }
 0x9eb   : > { %v1872_v20 = vadd.f32 %v1871_v18, %v1599_v13  ;;  %v1913_v21 = vadd.f32 %v1912_v19, %v1607_v14  ;;  %v1873_v22 = vpop.f32.mrb[14].mxu1  ;;  %v1914_v23 = vpop.f32.mrb[10].mxu0  ;;  %v4796_v18 = vld [vmem:[%s5182_s4 + $0x198] sm:$0xff]  }
 0x9ec   : > { %v2163_v27 = vmax.f32 %v1870_v17, 0.0  ;;  %v2165_v28 = vmax.f32 %v1911_v31, 0.0  ;;  %v1874_v30 = vpop.f32.mrb[15].mxu1  ;;  %v1915_v36 = vpop.f32.mrb[11].mxu0  ;;  %v4795_v31 = vld [vmem:[%s5182_s4 + $0x118] sm:$0xff]   ;;  %v4798_v22 = vld [vmem:[%s5182_s4 + $0x1e0] sm:$0xff]  }
 0x9ed   : > { %v2164_v37 = vmax.f32 %v1872_v20, 0.0  ;;  %v2166_v38 = vmax.f32 %v1913_v21, 0.0  ;;  %v4797_v21 = vld [vmem:[%s5182_s4 + $0x160] sm:$0xff]   ;;  %v4801_v30 = vld [vmem:[%s5182_s4 + $0x168] sm:$0xff]  }
 0x9ee   : > { %v2435_v45 = vpack.c.bf16 %v2163_v27, %v2163_v27  ;;  %v2437_v46 = vpack.c.bf16 %v2165_v28, %v2165_v28  ;;  %v4799_v23 = vld [vmem:[%s5182_s4 + $0x120] sm:$0xff]   ;;  %v5481_v28 = vsub.s32 4, %v5228_v33  ;;  %v4802_v36 = vld [vmem:[%s5182_s4 + $0x1e8] sm:$0xff]  }
 0x9ef   : > { %v2436_v39 = vpack.c.bf16 %v2164_v37, %v2164_v37  ;;  %v2438_v42 = vpack.c.bf16 %v2166_v38, %v2166_v38  ;;  %v4800_v27 = vld [vmem:[%s5182_s4 + $0x1a0] sm:$0xff]  }
 0x9f1   : > { %v5458_v51 = vpop.f32.mrb[16].mxu1  ;;  %v5460_v52 = vpop.f32.mrb[12].mxu0  ;;  %3255 = vmatprep.mubr.bf16.mxu1 %v2436_v39  ;;  %3295 = vmatprep.mubr.bf16.mxu0 %v2438_v42 }
 0x9f2   : > { %v1953_v53 = vpop.f32.mrb[17].mxu1  ;;  %v1994_v54 = vpop.f32.mrb[13].mxu0  ;;  %3256 = vmatmul.mubr.bf16.vlgmr.msra.gmra.mrb[28].mxu1 %v2435_v45  ;;  %3296 = vmatmul.mubr.bf16.vlgmr.msra.gmra.mrb[24].mxu0 %v2437_v46  ;;  %v4804_v45 = vld [vmem:[%s5182_s4 + $0x1a8] sm:$0xff]   ;;  %v1611_v46 = vrot.slane %v5435_v10, %v5481_v28 }
 0x9f3   : > { %v1954_v55 = vadd.f32 %v1953_v53, %v1615_v40  ;;  %v1995_v56 = vadd.f32 %v1994_v54, %v1623_v41  ;;  %4390 = vmatpush3.bf16.msra.mxu1 %v4783_v43  ;;  %4412 = vmatpush3.bf16.msra.mxu0 %v4784_v44  ;;  %v1955_v29 = vpop.f32.mrb[18].mxu1  ;;  %v1996_v58 = vpop.f32.mrb[14].mxu0  ;;  %v4803_v44 = vld [vmem:[%s5182_s4 + $0x128] sm:$0xff]   ;;  %v4805_v53 = vld [vmem:[%s5182_s4 + $0x170] sm:$0xff]  }
 0x9f4   : > { %v1956_v61 = vpop.f32.mrb[19].mxu1  ;;  %v1997_v26 = vpop.f32.mrb[15].mxu0  ;;  %4391 = vmatprep.subr.bf16.mxu1 %v4785_v49  ;;  %4413 = vmatprep.subr.bf16.mxu0 %v4786_v50  ;;  %v4806_v54 = vld [vmem:[%s5182_s4 + $0x1f0] sm:$0xff]   ;;  %v1952_v58 = vadd.f32 %v5458_v51, %v1611_v46  ;;  %v4813_v51 = vld [vmem:[%s5182_s4 + $0x240] sm:$0xff]   ;;  %v4835_v46 = vld [vmem:[%s5182_s4 + $0x228] sm:$0xff]  }
 0x9f5   : > { %v2168_v63 = vmax.f32 %v1954_v55, 0.0  ;;  %v2170_v0 = vmax.f32 %v1995_v56, 0.0  ;;  %v1631_v55 = vrot.slane %v5430_v8, %v5313_v1  ;;  %v1639_v56 = vrot.slane %v5430_v8, %v5338_v48  ;;  %v4807_v29 = vld [vmem:[%s5182_s4 + $0x130] sm:$0xff]   ;;  %v4810_v61 = vld [vmem:[%s5182_s4 + $0x1f8] sm:$0xff]  }
 0x9f6   : > { %v4811_v48 = vld [vmem:[%s5182_s4 + $0x138] sm:$0xff]  }
 0x9f7   : > { %v2440_v2 = vpack.c.bf16 %v2168_v63, %v2168_v63  ;;  %v2442_v3 = vpack.c.bf16 %v2170_v0, %v2170_v0  ;;  %4392 = vmatpush3.bf16.msra.mxu1 %v4787_v59  ;;  %4414 = vmatpush3.bf16.msra.mxu0 %v4788_v60  ;;  %v4809_v60 = vld [vmem:[%s5182_s4 + $0x178] sm:$0xff]  }
 0x9f8   : > { %4393 = vmatprep.subr.bf16.mxu1 %v4789_v62  ;;  %4415 = vmatprep.subr.bf16.mxu0 %v4790_v35  ;;  %v4812_v62 = vld [vmem:[%s5182_s4 + $0x1b8] sm:$0xff]   ;;  %v2167_v35 = vmax.f32 %v1952_v58, 0.0  ;;  %v4840_v58 = vld [vmem:[%s5182_s4 + $0x2b0] sm:$0xff]  }
 0x9f9   : > { %v5470_v12 = vpop.f32.mrb[20].mxu1  ;;  %v5472_v13 = vpop.f32.mrb[16].mxu0  ;;  %3335 = vmatprep.mubr.bf16.mxu1 %v2440_v2  ;;  %3375 = vmatprep.mubr.bf16.mxu0 %v2442_v3  ;;  %v4815_v3 = vld [vmem:[%s5182_s4 + $0x200] sm:$0xff]  }
 0x9fa   : > { %v2035_v14 = vpop.f32.mrb[21].mxu1  ;;  %v2076_v15 = vpop.f32.mrb[17].mxu0 }
 0x9fb   : > { %4394 = vmatpush3.bf16.msra.mxu1 %v4791_v4  ;;  %4416 = vmatpush3.bf16.msra.mxu0 %v4792_v5  ;;  %v2037_v16 = vpop.f32.mrb[22].mxu1  ;;  %v2078_v17 = vpop.f32.mrb[18].mxu0  ;;  %v2036_v1 = vadd.f32 %v2035_v14, %v1631_v55  ;;  %v2077_v26 = vadd.f32 %v2076_v15, %v1639_v56  ;;  %v2439_v4 = vpack.c.bf16 %v2167_v35, %v2167_v35  ;;  %v4817_v14 = vld [vmem:[%s5182_s4 + $0x248] sm:$0xff]  }
 0x9fc   : > { %v2038_v19 = vpop.f32.mrb[23].mxu1  ;;  %v2079_v20 = vpop.f32.mrb[19].mxu0  ;;  %4395 = vmatprep.subr.bf16.mxu1 %v4793_v6  ;;  %4417 = vmatprep.subr.bf16.mxu0 %v4794_v11  ;;  %v4816_v6 = vld [vmem:[%s5182_s4 + $0x280] sm:$0xff]   ;;  %v4818_v15 = vld [vmem:[%s5182_s4 + $0x2c8] sm:$0xff]   ;;  %v1647_v55 = vrot.slane %v5430_v8, %v5446_v24  ;;  %v1655_v56 = vrot.slane %v5430_v8, %v1622_v25 }
 0x9fd   : > { %v2172_v0 = vmax.f32 %v2036_v1, 0.0  ;;  %v2174_v2 = vmax.f32 %v2077_v26, 0.0  ;;  %v4819_v17 = vld [vmem:[%s5182_s4 + $0x208] sm:$0xff]   ;;  %v4822_v19 = vld [vmem:[%s5182_s4 + $0x2d0] sm:$0xff]   ;;  %v4843_v1 = vld [vmem:[%s5182_s4 + $0x238] sm:$0xff]  }
 0x9fe   : > { %v4823_v20 = vld [vmem:[%s5182_s4 + $0x210] sm:$0xff]  }
 0x9ff   : > { %4396 = vmatpush3.bf16.msra.mxu1 %v4795_v31  ;;  %4418 = vmatpush3.bf16.msra.mxu0 %v4796_v18  ;;  %v2444_v11 = vpack.c.bf16 %v2172_v0, %v2172_v0  ;;  %v2446_v16 = vpack.c.bf16 %v2174_v2, %v2174_v2  ;;  %v4820_v31 = vld [vmem:[%s5182_s4 + $0x288] sm:$0xff]   ;;  %v4821_v18 = vld [vmem:[%s5182_s4 + $0x250] sm:$0xff]  }
 0xa00   : > { %4397 = vmatprep.subr.bf16.mxu1 %v4797_v21  ;;  %4419 = vmatprep.subr.bf16.mxu0 %v4798_v22  ;;  %v4824_v21 = vld [vmem:[%s5182_s4 + $0x290] sm:$0xff]   ;;  %v4825_v22 = vld [vmem:[%s5182_s4 + $0x258] sm:$0xff]   ;;  %v4849_v0 = vld [vmem:[%s5182_s4 + $0x348] sm:$0xff]  }
 0xa01   : > { %v5485_v37 = vpop.f32.mrb[24].mxu1  ;;  %v2156_v38 = vpop.f32.mrb[20].mxu0 }
 0xa02   : > { %v5490_v39 = vadd.f32 %v2156_v38, %v1651_v9  ;;  %v5492_v42 = vpop.f32.mrb[25].mxu1  ;;  %v5494_v40 = vpop.f32.mrb[21].mxu0  ;;  %v1619_v9 = vrot.slane %v5435_v10, %v5427_v7  ;;  %v4808_v10 = vld [vmem:[%s5182_s4 + $0x1b0] sm:$0xff]   ;;  %v4830_v38 = vld [vmem:[%s5182_s4 + $0x2e0] sm:$0xff]  }
 0xa03   : > { %4398 = vmatpush3.bf16.msra.mxu1 %v4799_v23  ;;  %4420 = vmatpush3.bf16.msra.mxu0 %v4800_v27  ;;  %v2119_v41 = vpop.f32.mrb[26].mxu1  ;;  %v2160_v43 = vpop.f32.mrb[22].mxu0  ;;  %v4826_v23 = vld [vmem:[%s5182_s4 + $0x2d8] sm:$0xff]   ;;  %v2159_v25 = vadd.f32 %v5494_v40, %v1655_v56  ;;  %v4848_v40 = vld [vmem:[%s5182_s4 + $0x380] sm:$0xff]  }
 0xa04   : > { %v2120_v49 = vpop.f32.mrb[27].mxu1  ;;  %v2161_v50 = vpop.f32.mrb[23].mxu0  ;;  %4399 = vmatprep.subr.bf16.mxu1 %v4801_v30  ;;  %4421 = vmatprep.subr.bf16.mxu0 %v4802_v36  ;;  %v1993_v59 = vadd.f32 %v5460_v52, %v1619_v9  ;;  %v4814_v52 = vld [vmem:[%s5182_s4 + $0x2c0] sm:$0xff]   ;;  %v4827_v27 = vld [vmem:[%s5182_s4 + $0x218] sm:$0xff]   ;;  %v1627_v9 = vrot.slane %v5430_v8, %v5231_v34 }
 0xa05   : > { %v4828_v30 = vld [vmem:[%s5182_s4 + $0x298] sm:$0xff]   ;;  %v4829_v36 = vld [vmem:[%s5182_s4 + $0x260] sm:$0xff]   ;;  %v4836_v49 = vld [vmem:[%s5182_s4 + $0x2a8] sm:$0xff]  }
 0xa06   : > { %v2169_v63 = vmax.f32 %v1993_v59, 0.0  ;;  %v4831_v41 = vld [vmem:[%s5182_s4 + $0x220] sm:$0xff]   ;;  %v4837_v50 = vld [vmem:[%s5182_s4 + $0x270] sm:$0xff]  }
 0xa07   : > { %4400 = vmatpush3.bf16.msra.mxu1 %v4803_v44  ;;  %4422 = vmatpush3.bf16.msra.mxu0 %v4804_v45  ;;  %v4832_v43 = vld [vmem:[%s5182_s4 + $0x2a0] sm:$0xff]   ;;  %v4833_v44 = vld [vmem:[%s5182_s4 + $0x268] sm:$0xff]  }
 0xa08   : > { %4401 = vmatprep.subr.bf16.mxu1 %v4805_v53  ;;  %4423 = vmatprep.subr.bf16.mxu0 %v4806_v54  ;;  %v2441_v5 = vpack.c.bf16 %v2169_v63, %v2169_v63  ;;  %v4834_v45 = vld [vmem:[%s5182_s4 + $0x2e8] sm:$0xff]   ;;  %v1635_v53 = vrot.slane %v5430_v8, %v5335_v47  ;;  %v4838_v54 = vld [vmem:[%s5182_s4 + $0x2f0] sm:$0xff]   ;;  %v4841_v47 = vld [vmem:[%s5182_s4 + $0x278] sm:$0xff]   ;;  %v2178_v63 = vmax.f32 %v2159_v25, 0.0 }
 0xa0a   : > { %v2075_v59 = vadd.f32 %v5472_v13, %v1635_v53  ;;  %v4846_v13 = vld [vmem:[%s5182_s4 + $0x3c0] sm:$0xff]  }
 0xa0b   : > { %4402 = vmatpush3.bf16.msra.mxu1 %v4807_v29  ;;  %4424 = vmatpush3.bf16.msra.mxu0 %v4808_v10  ;;  %v4839_v29 = vld [vmem:[%s5182_s4 + $0x230] sm:$0xff]   ;;  %v2034_v10 = vadd.f32 %v5470_v12, %v1627_v9  ;;  %v4844_v12 = vld [vmem:[%s5182_s4 + $0x2b8] sm:$0xff]  }
 0xa0c   : > { %4403 = vmatprep.subr.bf16.mxu1 %v4809_v60  ;;  %4425 = vmatprep.subr.bf16.mxu0 %v4810_v61  ;;  %v4842_v60 = vld [vmem:[%s5182_s4 + $0x2f8] sm:$0xff]   ;;  %v2118_v61 = vadd.f32 %v5492_v42, %v1647_v55  ;;  %v4847_v42 = vld [vmem:[%s5182_s4 + $0x300] sm:$0xff]   ;;  %v4872_v9 = vld [vmem:[%s5182_s4 + $0x3b0] sm:$0xff]   ;;  %v2177_v55 = vmax.f32 %v5490_v39, 0.0 }
 0xa0d   : > { %v2171_v26 = vmax.f32 %v2034_v10, 0.0 }
 0xa0e   : > { %v2176_v35 = vmax.f32 %v2118_v61, 0.0 }
 0xa0f   : > { %4404 = vmatpush3.bf16.msra.mxu1 %v4811_v48  ;;  %4426 = vmatpush3.bf16.msra.mxu0 %v4812_v62  ;;  %v4845_v48 = vld [vmem:[%s5182_s4 + $0x340] sm:$0xff]   ;;  %v2173_v62 = vmax.f32 %v2075_v59, 0.0 }
 0xa10   : > { %4433 = vmatprep.subr.bf16.mxu1 %v4813_v51  ;;  %4455 = vmatprep.subr.bf16.mxu0 %v4814_v52  ;;  %v2443_v51 = vpack.c.bf16 %v2171_v26, %v2171_v26  ;;  %v2448_v2 = vpack.c.bf16 %v2176_v35, %v2176_v35 }
 0xa11   : > { %v2445_v52 = vpack.c.bf16 %v2173_v62, %v2173_v62 }
 0xa12   : > { %3336 = vmatmul.mubr.bf16.vlgmr.msra.gmra.mrb[32].mxu1 %v2439_v4  ;;  %3376 = vmatmul.mubr.bf16.vlgmr.msra.gmra.mrb[28].mxu0 %v2441_v5  ;;  %v2450_v4 = vpack.c.bf16 %v2178_v63, %v2178_v63  ;;  %v4851_v5 = vld [vmem:[%s5182_s4 + $0x308] sm:$0xff]  }
 0xa13   : > { %4434 = vmatpush3.bf16.msra.mxu1 %v4815_v3  ;;  %3415 = vmatprep.mubr.bf16.mxu1 %v2444_v11  ;;  %v4850_v3 = vld [vmem:[%s5182_s4 + $0x3c8] sm:$0xff]   ;;  %v4853_v11 = vld [vmem:[%s5182_s4 + $0x350] sm:$0xff]  }
 0xa14   : > { %4456 = vmatpush3.bf16.msra.mxu0 %v4816_v6  ;;  %3455 = vmatprep.mubr.bf16.mxu0 %v2446_v16  ;;  %v4852_v6 = vld [vmem:[%s5182_s4 + $0x388] sm:$0xff]   ;;  %v4856_v16 = vld [vmem:[%s5182_s4 + $0x390] sm:$0xff]  }
 0xa15   : > { %4435 = vmatprep.subr.bf16.mxu1 %v4817_v14  ;;  %4457 = vmatprep.subr.bf16.mxu0 %v4818_v15  ;;  %v4854_v14 = vld [vmem:[%s5182_s4 + $0x3d0] sm:$0xff]  }
 0xa16   : > { %v4855_v15 = vld [vmem:[%s5182_s4 + $0x310] sm:$0xff]  }
 0xa17   : > { %4436 = vmatpush3.bf16.msra.mxu1 %v4819_v17  ;;  %v4857_v17 = vld [vmem:[%s5182_s4 + $0x358] sm:$0xff]  }
 0xa18   : > { %4458 = vmatpush3.bf16.msra.mxu0 %v4820_v31  ;;  %4437 = vmatprep.subr.bf16.mxu1 %v4821_v18  ;;  %v4858_v31 = vld [vmem:[%s5182_s4 + $0x3d8] sm:$0xff]  }
 0xa19   : > { %4459 = vmatprep.subr.bf16.mxu0 %v4822_v19  ;;  %v4859_v18 = vld [vmem:[%s5182_s4 + $0x318] sm:$0xff]  }
 0xa1a   : > { %v4860_v19 = vld [vmem:[%s5182_s4 + $0x398] sm:$0xff]  }
 0xa1b   : > { %4438 = vmatpush3.bf16.msra.mxu1 %v4823_v20  ;;  %v4861_v20 = vld [vmem:[%s5182_s4 + $0x360] sm:$0xff]  }
 0xa1c   : > { %4460 = vmatpush3.bf16.msra.mxu0 %v4824_v21  ;;  %4439 = vmatprep.subr.bf16.mxu1 %v4825_v22  ;;  %v4862_v21 = vld [vmem:[%s5182_s4 + $0x3e0] sm:$0xff]  }
 0xa1d   : > { %4461 = vmatprep.subr.bf16.mxu0 %v4826_v23  ;;  %v4863_v22 = vld [vmem:[%s5182_s4 + $0x320] sm:$0xff]  }
 0xa1e   : > { %v4864_v23 = vld [vmem:[%s5182_s4 + $0x3a0] sm:$0xff]  }
 0xa1f   : > { %4440 = vmatpush3.bf16.msra.mxu1 %v4827_v27  ;;  %v4865_v27 = vld [vmem:[%s5182_s4 + $0x368] sm:$0xff]  }
 0xa20   : > { %4462 = vmatpush3.bf16.msra.mxu0 %v4828_v30  ;;  %4441 = vmatprep.subr.bf16.mxu1 %v4829_v36  ;;  %v4866_v30 = vld [vmem:[%s5182_s4 + $0x3e8] sm:$0xff]  }
 0xa21   : > { %4463 = vmatprep.subr.bf16.mxu0 %v4830_v38  ;;  %v4867_v36 = vld [vmem:[%s5182_s4 + $0x328] sm:$0xff]   ;;  %v1643_v38 = vrot.slane %v5430_v8, %v5481_v28  ;;  %v4875_v8 = vld [vmem:[%s5182_s4 + $0x338] sm:$0xff]  }
 0xa23   : > { %4442 = vmatpush3.bf16.msra.mxu1 %v4831_v41  ;;  %v4868_v41 = vld [vmem:[%s5182_s4 + $0x3a8] sm:$0xff]  }
 0xa24   : > { %4464 = vmatpush3.bf16.msra.mxu0 %v4832_v43  ;;  %4443 = vmatprep.subr.bf16.mxu1 %v4833_v44  ;;  %v4869_v43 = vld [vmem:[%s5182_s4 + $0x370] sm:$0xff]  }
 0xa25   : > { %4465 = vmatprep.subr.bf16.mxu0 %v4834_v45  ;;  %v4870_v44 = vld [vmem:[%s5182_s4 + $0x3f0] sm:$0xff]  }
 0xa26   : > { %v4871_v45 = vld [vmem:[%s5182_s4 + $0x330] sm:$0xff]  }
 0xa27   : > { %4444 = vmatpush3.bf16.msra.mxu1 %v4835_v46  ;;  %v2116_v46 = vadd.f32 %v5485_v37, %v1643_v38  ;;  %v2449_v37 = vpack.c.bf16 %v2177_v55, %v2177_v55 }
 0xa28   : > { %4466 = vmatpush3.bf16.msra.mxu0 %v4836_v49  ;;  %4445 = vmatprep.subr.bf16.mxu1 %v4837_v50  ;;  %v4873_v49 = vld [vmem:[%s5182_s4 + $0x378] sm:$0xff]  }
 0xa29   : > { %4467 = vmatprep.subr.bf16.mxu0 %v4838_v54  ;;  %v4874_v50 = vld [vmem:[%s5182_s4 + $0x3f8] sm:$0xff]   ;;  %v2175_v53 = vmax.f32 %v2116_v46, 0.0 }
 0xa2a   : > { %v4876_v54 = vld [vmem:[%s5182_s4 + $0x3b8] sm:$0xff]  }
 0xa2b   : > { %4446 = vmatpush3.bf16.msra.mxu1 %v4839_v29  ;;  %v2447_v56 = vpack.c.bf16 %v2175_v53, %v2175_v53 }
 0xa2c   : > { %4468 = vmatpush3.bf16.msra.mxu0 %v4840_v58  ;;  %4447 = vmatprep.subr.bf16.mxu1 %v4841_v47  ;;  %v5598_v58 = vld [vmem:[%s5157_s15] sm:$0xff] }
 0xa2d   : > { %4469 = vmatprep.subr.bf16.mxu0 %v4842_v60  ;;  %v2454_v47 = vrot.slane %v5598_v58, %v5481_v28 }
 0xa2f   : > { %4448 = vmatpush3.bf16.msra.mxu1 %v4843_v1 }
 0xa30   : > { %4470 = vmatpush3.bf16.msra.mxu0 %v4844_v12  ;;  %4477 = vmatprep.subr.bf16.mxu1 %v4845_v48 }
 0xa31   : > { %4499 = vmatprep.subr.bf16.mxu0 %v4846_v13 }
 0xa32   : > { %3416 = vmatmul.mubr.bf16.vlgmr.msra.gmra.mrb[36].mxu1 %v2443_v51 }
 0xa33   : > { %3456 = vmatmul.mubr.bf16.vlgmr.msra.gmra.mrb[32].mxu0 %v2445_v52  ;;  %4478 = vmatpush3.bf16.msra.mxu1 %v4847_v42 }
 0xa34   : > { %3495 = vmatprep.mubr.bf16.mxu1 %v2448_v2  ;;  %4500 = vmatpush3.bf16.msra.mxu0 %v4848_v40 }
 0xa35   : > { %3535 = vmatprep.mubr.bf16.mxu0 %v2450_v4  ;;  %4479 = vmatprep.subr.bf16.mxu1 %v4849_v0 }
 0xa36   : > { %4501 = vmatprep.subr.bf16.mxu0 %v4850_v3 }
 0xa37   : > { %4480 = vmatpush3.bf16.msra.mxu1 %v4851_v5 }
 0xa38   : > { %4502 = vmatpush3.bf16.msra.mxu0 %v4852_v6  ;;  %4481 = vmatprep.subr.bf16.mxu1 %v4853_v11 }
 0xa39   : > { %4503 = vmatprep.subr.bf16.mxu0 %v4854_v14 }
 0xa3b   : > { %4482 = vmatpush3.bf16.msra.mxu1 %v4855_v15 }
 0xa3c   : > { %4504 = vmatpush3.bf16.msra.mxu0 %v4856_v16  ;;  %4483 = vmatprep.subr.bf16.mxu1 %v4857_v17 }
 0xa3d   : > { %4505 = vmatprep.subr.bf16.mxu0 %v4858_v31 }
 0xa3f   : > { %4484 = vmatpush3.bf16.msra.mxu1 %v4859_v18 }
 0xa40   : > { %4506 = vmatpush3.bf16.msra.mxu0 %v4860_v19  ;;  %4485 = vmatprep.subr.bf16.mxu1 %v4861_v20 }
 0xa41   : > { %4507 = vmatprep.subr.bf16.mxu0 %v4862_v21 }
 0xa43   : > { %4486 = vmatpush3.bf16.msra.mxu1 %v4863_v22 }
 0xa44   : > { %4508 = vmatpush3.bf16.msra.mxu0 %v4864_v23  ;;  %4487 = vmatprep.subr.bf16.mxu1 %v4865_v27 }
 0xa45   : > { %4509 = vmatprep.subr.bf16.mxu0 %v4866_v30 }
 0xa47   : > { %4488 = vmatpush3.bf16.msra.mxu1 %v4867_v36 }
 0xa48   : > { %4510 = vmatpush3.bf16.msra.mxu0 %v4868_v41  ;;  %4489 = vmatprep.subr.bf16.mxu1 %v4869_v43 }
 0xa49   : > { %4511 = vmatprep.subr.bf16.mxu0 %v4870_v44 }
 0xa4b   : > { %4490 = vmatpush3.bf16.msra.mxu1 %v4871_v45 }
 0xa4c   : > { %4512 = vmatpush3.bf16.msra.mxu0 %v4872_v9  ;;  %4491 = vmatprep.subr.bf16.mxu1 %v4873_v49 }
 0xa4d   : > { %4513 = vmatprep.subr.bf16.mxu0 %v4874_v50 }
 0xa4f   : > { %4492 = vmatpush3.bf16.msra.mxu1 %v4875_v8 }
 0xa50   : > { %4514 = vmatpush3.bf16.msra.mxu0 %v4876_v54 }
 0xa52   : > { %3496 = vmatmul.mubr.bf16.vlgmr.msra.gmra.mrb[40].mxu1 %v2447_v56 }
 0xa53   : > { %3536 = vmatmul.mubr.bf16.vlgmr.msra.gmra.mrb[36].mxu0 %v2449_v37 }
 0xac5   : > { %v4361_v29 = vpop.f32.mrb[28].mxu1  ;;  %v4383_v10 = vpop.f32.mrb[24].mxu0 }
 0xac6   : > { %v4362_v59 = vpop.f32.mrb[29].mxu1  ;;  %v4384_v60 = vpop.f32.mrb[25].mxu0 }
 0xac7   : > { %v4363_v61 = vadd.f32 %v4362_v59, %v4361_v29  ;;  %v4385_v25 = vadd.f32 %v4384_v60, %v4383_v10  ;;  %v4364_v1 = vpop.f32.mrb[30].mxu1  ;;  %v4386_v39 = vpop.f32.mrb[26].mxu0 }
 0xac8   : > { %v4365_v26 = vpop.f32.mrb[31].mxu1  ;;  %v4387_v12 = vpop.f32.mrb[27].mxu0  ;;  %v4289_v1 = vld [vmem:[%s5717_s3 + $0x80] sm:$0xff] (!%p4288_p1) }
 0xac9   : > { %v3258_v48 = vadd.f32 %v4363_v61, %v2454_v47  ;;  %v3560_v47 = vrot.slane %v5598_v58, %v5446_v24  ;;  %v4290_v24 = vld [vmem:[%s5717_s3 + $0x88] sm:$0xff] (!%p4288_p1)  ;;  %v4292_v26 = vld [vmem:[%s5717_s3 + $0x98] sm:$0xff] (!%p4288_p1)  ;;  %v5012_v12 = vmov (!%p4288_p1), 0.0  }
 0xaca   : > { %v4651_v39 = vpack.c.bf16 (!%p4288_p1), %v4290_v24, %v4289_v1  ;;  %4615 = vmatprep.mubr.msk.f32.mxu0 (!%p4288_p1), %vm5011_vm10, %v5012_v12  ;;  %4622 = vmatprep.mubr.msk.f32.mxu1 (!%p4288_p1), %vm5011_vm10, %v5012_v12 }
 0xacb   : > { %v3298_v62 = vadd.f32 %v4385_v25, %v3258_v48 }
 0xae5   : > { %v4405_v13 = vpop.f32.mrb[32].mxu1  ;;  %v4427_v35 = vpop.f32.mrb[28].mxu0 }
 0xae6   : > { %v4406_v63 = vpop.f32.mrb[33].mxu1  ;;  %v4428_v42 = vpop.f32.mrb[29].mxu0 }
 0xae7   : > { %v4407_v51 = vadd.f32 %v4406_v63, %v4405_v13  ;;  %v4429_v40 = vadd.f32 %v4428_v42, %v4427_v35  ;;  %v4408_v52 = vpop.f32.mrb[34].mxu1  ;;  %v4430_v0 = vpop.f32.mrb[30].mxu0  ;;  %v4296_v13 = vld [vmem:[%s5717_s3 + $0xc8] sm:$0xff] (!%p4288_p1)  ;;  %v4293_v63 = vld [vmem:[%s5717_s3 + $0xa0] sm:$0xff] (!%p4288_p1) }
 0xae8   : > { %v4409_v2 = vpop.f32.mrb[35].mxu1  ;;  %v4431_v28 = vpop.f32.mrb[31].mxu0  ;;  %v3582_v42 = vrot.slane (!%p4288_p1), %v4293_v63, %v5231_v34 }
 0xae9   : > { %v3338_v3 = vadd.f32 %v4407_v51, %v3298_v62  ;;  %v4295_v62 = vld [vmem:[%s5717_s3 + $0xc0] sm:$0xff] (!%p4288_p1)  ;;  %v5013_v2 = vmov (!%p4288_p1), 0  }
 0xaea   : > { %v4657_v35 = vpack.c.bf16 (!%p4288_p1), %v4296_v13, %v4295_v62  ;;  %4898 = vset.pattern.permute.xlu0 (!%p4288_p1), %v5013_v2  ;;  %v4297_v28 = vld [vmem:[%s5717_s3 + $0xe0] sm:$0xff] (!%p4288_p1) }
 0xaeb   : > { %v3378_v4 = vadd.f32 %v4429_v40, %v3338_v3  ;;  %v3665_v3 = vrot.slane (!%p4288_p1), %v4297_v28, %v5231_v34 }
 0xb05   : > { %v4449_v5 = vpop.f32.mrb[36].mxu1 }
 0xb06   : > { %v4471_v6 = vpop.f32.mrb[32].mxu0  ;;  %v4450_v11 = vpop.f32.mrb[37].mxu1 }
 0xb07   : > { %v4451_v14 = vadd.f32 %v4450_v11, %v4449_v5  ;;  %v4472_v15 = vpop.f32.mrb[33].mxu0  ;;  %v4452_v16 = vpop.f32.mrb[38].mxu1  ;;  %v4300_v11 = vld [vmem:[%s5717_s3 + $0x100] sm:$0xff] (!%p4288_p1) }
 0xb08   : > { %v4473_v17 = vadd.f32 %v4472_v15, %v4471_v6  ;;  %v4474_v31 = vpop.f32.mrb[34].mxu0  ;;  %v4453_v18 = vpop.f32.mrb[39].mxu1 }
 0xb09   : > { %v3418_v19 = vadd.f32 %v4451_v14, %v3378_v4  ;;  %v4475_v20 = vpop.f32.mrb[35].mxu0  ;;  %v3742_v14 = vand.u32 (!%p4288_p1), 127, %v685_v32  ;;  %v4303_v32 = vld [vmem:[%s5717_s3 + $0x140] sm:$0xff] (!%p4288_p1) }
 0xb0b   : > { %v3458_v21 = vadd.f32 %v4473_v17, %v3418_v19  ;;  %vm3743_vm11 = vcmp.eq.s32.totalorder (!%p4288_p1), %v5228_v33, %v3742_v14  ;;  %v4301_v33 = vld [vmem:[%s5717_s3 + $0x120] sm:$0xff] (!%p4288_p1) }
 0xb0c   : > { %v4299_v15 = vsel (!%p4288_p1), %vm3743_vm11, 1.0, %v5012_v12 }
 0xb25   : > { %v4493_v22 = vpop.f32.mrb[40].mxu1 }
 0xb26   : > { %v4515_v23 = vpop.f32.mrb[36].mxu0  ;;  %v4494_v27 = vpop.f32.mrb[41].mxu1 }
 0xb27   : > { %v4495_v30 = vadd.f32 %v4494_v27, %v4493_v22  ;;  %v4516_v36 = vpop.f32.mrb[37].mxu0  ;;  %v4496_v38 = vpop.f32.mrb[42].mxu1 }
 0xb28   : > { %v4517_v41 = vadd.f32 %v4516_v36, %v4515_v23  ;;  %v4518_v43 = vpop.f32.mrb[38].mxu0  ;;  %v4497_v44 = vpop.f32.mrb[43].mxu1  ;;  %v4304_v38 = vld [vmem:[%s5717_s3 + $0x160] sm:$0xff] (!%p4288_p1) }
 0xb29   : > { %v3498_v45 = vadd.f32 %v4495_v30, %v3458_v21  ;;  %v4519_v46 = vpop.f32.mrb[39].mxu0 }
 0xb2b   : > { %v3538_v9 = vadd.f32 %v4517_v41, %v3498_v45 }
 0xb2d   : > { %v3543_v49 = vadd.f32 %v3538_v9, %v5348_v57  ;;  %v3565_v57 = vrot.slane %v5598_v58, %v5427_v7  ;;  %v4291_v7 = vld [vmem:[%s5717_s3 + $0x90] sm:$0xff] (!%p4288_p1)  ;;  %v5010_v58 = vmov (!%p4288_p1), 0.0|0.0  }
 0xb2e   : > { %4650 = vmatprep.subr.bf16.mxu0 (!%p4288_p1), %v5010_v58  ;;  %4656 = vmatprep.subr.bf16.mxu1 (!%p4288_p1), %v5010_v58  ;;  %v4654_v48 = vpack.c.bf16 (!%p4288_p1), %v4292_v26, %v4291_v7 }
 0xb2f   : > { %v3544_v50 = vsel %vm689_vm6, %v3543_v49, 0.0  ;;  %4652 = vmatpush3.bf16.msra.mxu0 (!%p4288_p1), %v4651_v39  ;;  %4658 = vmatpush3.bf16.msra.mxu1 (!%p4288_p1), %v4657_v35 }
 0xb30   : > { %3545 = vadd.xlane.f32.xlu0 %v3544_v50  ;;  %4653 = vmatprep.subr.bf16.mxu0 (!%p4288_p1), %v5010_v58 }
 0xb31   : > { %4625 = vmatprep.subr.mxu1 (!%p4288_p1), %v5012_v12 }
 0xb33   : > { %4655 = vmatpush3.bf16.msra.mxu0 (!%p4288_p1), %v4654_v48 }
 0xb34   : > { %4630 = vmatprep.subr.mxu0 (!%p4288_p1), %v5012_v12 }
 0xbbd   : > { %v3546_v8 = vpop.xlane.xlu0 %3545 }
 0xbbe   : > { %v3547_v53 = vmul.f32 0.03125, %v3546_v8 }
 0xbc0   : > { %v3548_v54 = vsub.f32 %v3543_v49, %v3547_v53 }
 0xbc2   : > { %v3549_v55 = vmul.f32 %v3548_v54, %v3548_v54 }
 0xbc4   : > { %v3550_v56 = vsel %vm689_vm6, %v3549_v55, 0.0 }
 0xbc5   : > { %3551 = vadd.xlane.f32.xlu0 %v3550_v56 }
 0xc52   : > { %v3552_v37 = vpop.xlane.xlu0 %3551 }
 0xc53   : > { %v3553_v29 = vmul.f32 0.03125, %v3552_v37 }
 0xc55   : > { %v3554_v10 = vadd.f32 1e-05, %v3553_v29 }
 0xc57   : > { %4895 = vrsqrt.f32 %v3554_v10 }
 0xc61   : > { %v4896_v59 = vpop.eup %4895 }
 0xc62   : > { %v3556_v60 = vmul.f32 %v4896_v59, %v3548_v54  ;;  %3571 = sbr.rel (%p4288_p1) target bundleno = 4180 (0x1054), region = 68 }
 0xc64   : > { %v3561_v61 = vmul.f32 %v3560_v47, %v3556_v60 }
 0xc66   : > { %v3566_v25 = vadd.f32 %v3565_v57, %v3561_v61 }
 0xc68   : > { %3567 = vst.msk [vmem:[#allocation2] sm:$0xff] %vm689_vm6, %v3566_v25  ;;  %4616 = vmatmul.mubr.msk.f32.vlgmr.msra.gmra.mrb[0].mxu0 (!%p4288_p1), %vm689_vm6, %v3566_v25 }
 0xc69   : > { %4632 = vmatprep.mubr.msk.f32.mxu0 %vm5011_vm10, %v5012_v12  ;;  %4631 = vmatpush3.msk.msra.mxu0 %vm3845_vm12, %v4303_v32 }
 0xd3b   : > { %v3652_v51 = vpop.f32.mrb[0].mxu0 }
 0xd3c   : > { %v3653_v40 = vadd.f32 %v3652_v51, %v3582_v42  ;;  %v4617_v52 = vpop.f32.mrb[1].mxu0 }
 0xd3e   : > { %v3656_v0 = vmax.f32 %v3653_v40, 0.0 }
 0xd40   : > { %4623 = vmatmul.mubr.msk.f32.vlgmr.msra.gmra.mrb[0].mxu1 %vm1445_vm8, %v3656_v0 }
 0xd41   : > { %4627 = vmatprep.mubr.msk.f32.mxu1 %vm5011_vm10, %v5012_v12  ;;  %4626 = vmatpush3.msra.mxu1 %v4300_v11 }
 0xe13   : > { %v3735_v4 = vpop.f32.mrb[0].mxu1 }
 0xe14   : > { %v3736_v5 = vadd.f32 %v3735_v4, %v3665_v3  ;;  %v4624_v6 = vpop.f32.mrb[1].mxu1 }
 0xe16   : > { %3748 = vperm.xlu0 %4898, %v3736_v5  }
 0xe95   : > { %v3749_v16 = vpop.permute.xlu0 %3748 }
 0xe96   : > { %v3751_v17 = vmul.f32 %v4299_v15, %v3749_v16 }
 0xe98   : > { %v3752_v31 = vsel %vm772_vm7, %v3751_v17, 0.0 }
 0xe99   : > { %v3753_v18 = vrot.slane %v3752_v31, 4 }
 0xe9b   : > { %v3754_v34 = vadd.f32 %v3753_v18, %v3752_v31 }
 0xe9d   : > { %v3755_v19 = vrot.slane %v3754_v34, 2 }
 0xe9f   : > { %v3756_v20 = vadd.f32 %v3755_v19, %v3754_v34 }
 0xea1   : > { %v3757_v21 = vrot.slane %v3756_v20, 1 }
 0xea3   : > { %v3758_v22 = vadd.f32 %v3757_v21, %v3756_v20 }
 0xea5   : > { %4628 = vmatmul.mubr.msk.f32.vlgmr.msra.gmra.mrb[2].mxu1 %vm772_vm7, %v3758_v22 }
 0xf78   : > { %v3832_v23 = vpop.f32.mrb[2].mxu1 }
 0xf79   : > { %v3833_v27 = vadd.f32 %v4301_v33, %v3832_v23  ;;  %v4629_v30 = vpop.f32.mrb[3].mxu1 }
 0xf7b   : > { %v3836_v36 = vmax.f32 %v3833_v27, 0.0 }
 0xf7d   : > { %4633 = vmatmul.mubr.msk.f32.vlgmr.msra.gmra.mrb[2].mxu0 %vm3841_vm13, %v3836_v36 }
0x1050   : > { %v3915_v41 = vpop.f32.mrb[2].mxu0 }
0x1051   : > { %v3916_v43 = vadd.f32 %v4304_v38, %v3915_v41  ;;  %v4634_v44 = vpop.f32.mrb[3].mxu0 }
0x1053   : > { %3920 = vst.msk [vmem:[%s5186_s25] sm:$0x1] %vm3919_vm14, %v3916_v43 }
0x1054 PF: > { %s5757_s22 = sld [smem:[#allocation8_spill]]  ;;  %s3934_s17 = sshll.u32 %s5186_s25, 4  ;;  %s3935_s17 = int_to_ptr.vmem [resolvable:$true] %s3934_s17 }
0x1055   : > { %s5759_s16 = sld [smem:[#allocation19_spill]]  ;;  %s5761_s11 = sand.u32 1, %s4969_s14  }
0x1056   : > { %s3922_s26 = scalar_lea.sflag [#allocation4], %s5761_s11  ;;  %s4899_s27 = scalar_lea.vmem %s3935_s17, 16 }
0x1057   : > { %p4900_p2 = scmp.ne.s32.totalorder %s3935_s17, %s4899_s27  ;;  %s5014_s0 = smov [#allocation3]  }
0x1058   : > { %s4903_s12 = sshll.u32 %s5014_s0, 4  ;;  %s4904_s12 = int_to_ptr.vmem [resolvable:$false] %s4903_s12 }
0x1059   : > { %p4901_p4 = pnand %p4900_p2, %p5119_p3  ;;  %s4905_s23 = scalar_lea.vmem %s4904_s12, 32 }
0x105a   : > { %s4307_s18 = sshll.u32 %s5757_s22, 4  ;;  %p4906_p6 = scmp.lt.s32.totalorder %s3935_s17, %s4904_s12 }
0x105b   : > { %s5760_s10 = smov %s5759_s16  ;;  %s5664_s20 = scalar_lea.hbm %s5759_s16, %s4307_s18 }
0x105c   : > { %p4902_p5 = pneg %p4901_p4  ;;  %p4907_p7 = scmp.lt.s32.totalorder %s4905_s23, %s4899_s27 }
0x105e   : > { %p4908_p8 = por %p4907_p7, %p4906_p6 }
0x1060   : > { %p4909_p10 = pnand %p4908_p8, %p4902_p5 }
0x1062   : > { %4912 = shalt.err (!%p4909_p10)
}
0x1063   : > { %s4913_s25 = scalar_lea.hbm %s5664_s20, 16  ;;  %s4917_s21 = scalar_lea.hbm %s5760_s10, 32 }
0x1064   : > { %p4914_p11 = scmp.ne.s32.totalorder %s5664_s20, %s4913_s25  ;;  %p4918_p0 = scmp.lt.u32.totalorder %s5664_s20, %s5760_s10 }
0x1065   : > { %p4919_p1 = scmp.lt.u32.totalorder %s4917_s21, %s4913_s25  ;;  %p4921_p4 = scmp.lt.u32.totalorder %s4913_s25, %s5664_s20 }
0x1066   : > { %p4915_p12 = pnand %p4914_p11, %p5119_p3 }
0x1067   : > { %p4920_p2 = por %p4919_p1, %p4918_p0 }
0x1068   : > { %p4916_p13 = pneg %p4915_p12 }
0x1069   : > { %p4922_p5 = por %p4921_p4, %p4920_p2 }
0x106b   : > { %p4923_p6 = pnand %p4922_p5, %p4916_p13 }
0x106d   : > { %4926 = shalt.err (!%p4923_p6)
}
0x106e   : > { %4659 = dma.vmem_to_hbm [thread:$0]  (%p5119_p3), %s3935_s17, 16, %s5664_s20, %s3922_s26  }
0x106f PF: > { %s5762_s28 = sld [smem:[#allocation11_spill]]  ;;  %s5763_s22 = sld [smem:[#allocation6_spill]] }
0x1075   : > { %p4665_p7 = scmp.ge.s32.totalorder %s5762_s28, 2  ;;  %s3946_s29 = sand.u32 1, %s5763_s22  }
0x1076   : > { %s3947_s13 = scalar_lea.sflag [#allocation4], %s3946_s29 }
0x1077   : > { %p4662_p8 = pnand %p4665_p7, %p5129_p9 }
0x1079   : > { %4960 = dma.done.wait (!%p4662_p8), %s3947_s13, 16  }
0x107a   : > { %4962 = vsyncadd (!%p4662_p8), %s3947_s13, 4294967280  ;;  %s23_s20 = sadd.s32 1, %s5762_s28   ;;  %s5765_s16 = sld [smem:[#allocation7_spill]] }
0x107b   : > { %p20_p10 = scmp.ge.s32.totalorder %s23_s20, 6   ;;  %s5766_s15 = sld [smem:[#allocation16_spill]] }
0x107c   : > { %s5767_s30 = sld [smem:[#allocation9_spill]]  ;;  %s5768_s17 = sld [smem:[#allocation10_spill]] }
0x107d   : > { %s5769_s18 = sld [smem:[#allocation12_spill]]  ;;  %s5770_s19 = sld [smem:[#allocation14_spill]] }
0x107e   : > { %s5771_s13 = smov %s4969_s14  ;;  %22 = sbr.rel (!%p20_p10) target bundleno = 9 (0x9), region = 135 }
0x1080   : > { %s5772_s14 = smov %s5765_s16 }
0x1082   : > { %s5773_s16 = smov %s5767_s30 }
0x1085   :  { %3951 = vsyncpa [#allocation4], 1 }
0x1086   :  { %3953 = vsyncpa [#allocation4 + $0x1], 1 }

</bundles_post_ra>
